<compile_context>
chip_gen: v5e
topology: v5e:2x2
jax: 0.10.0
libtpu: 0.0.40
codegen_flags: <defaults>
</compile_context>

<pallas_src>
import functools

import jax
import jax.numpy as jnp
import numpy as np
from jax.experimental import pallas as pl
from jax.experimental.pallas import tpu as pltpu


def _conv_twa_kernel(x_ref, h_ref, w_ref, b_ref, o_ref, xpad_ref, hpad_ref,
                     *, H, W, KH, KW, C, CH):
    # x_ref: (1, H, W*C)      lane-dense activations (compute dtype)
    # h_ref: (1, H, W*CH)
    # w_ref: (KH*KW*(W*C + W*CH), W*COUT)   block-diagonal conv weight
    # b_ref: (1, W*COUT) f32
    # o_ref: (1, H, W*COUT)
    # xpad_ref / hpad_ref: f32 VMEM scratch, shape (H+2ph, (W+2pw)*C[H])
    ph, pw = KH // 2, KW // 2
    WC, WCH = W * C, W * CH

    # Zero-padded activations built on-chip (no HBM round-trip for the concat).
    xpad_ref[...] = jnp.zeros_like(xpad_ref)
    hpad_ref[...] = jnp.zeros_like(hpad_ref)
    xpad_ref[ph:ph + H, pw * C:pw * C + WC] = x_ref[0].astype(xpad_ref.dtype)
    hpad_ref[ph:ph + H, pw * CH:pw * CH + WCH] = h_ref[0].astype(hpad_ref.dtype)

    # Lane-dense im2col: one (H, W*C) / (H, W*CH) window per conv tap,
    # concatenated along the contraction axis -> a single fused MXU matmul.
    cols = []
    for kh in range(KH):
        for kw in range(KW):
            cols.append(xpad_ref[kh:kh + H, kw * C:kw * C + WC])
            cols.append(hpad_ref[kh:kh + H, kw * CH:kw * CH + WCH])
    patch = jnp.concatenate(cols, axis=1).astype(w_ref.dtype)

    cc = jnp.dot(patch, w_ref[...], preferred_element_type=jnp.float32)
    cc = cc + b_ref[...]                               # (H, W*COUT) f32
    gate = jax.nn.sigmoid(cc)

    # Elementwise gating and store stay lane-dense ((H, W*C), W*C % 128 == 0).
    x = x_ref[0].astype(jnp.float32)
    h = h_ref[0].astype(jnp.float32)
    o_ref[0] = (gate * x + (1.0 - gate) * h).astype(o_ref.dtype)


def conv_twa_cell(x, h, w_hwio, b, kernel_size, *, compute_dtype=jnp.bfloat16):
    """x, h: (B, H, W, C) NHWC.  w_hwio: (KH, KW, C+CH, CH) HWIO.  b: (CH,)."""
    B, H, W, C = x.shape
    CH = h.shape[-1]
    KH, KW = kernel_size
    ph, pw = KH // 2, KW // 2
    CTOT = C + CH
    COUT = w_hwio.shape[-1]
    assert w_hwio.shape == (KH, KW, CTOT, COUT)
    assert KH % 2 == 1 and KW % 2 == 1, "symmetric SAME padding needs odd kernels"
    assert C == CH == COUT, "elementwise gating requires input_dim == hidden_dim"

    WC, WCH, WCOUT = W * C, W * CH, W * COUT
    KBIG = KH * KW * (WC + WCH)

    # Lane-dense activation views: free, row-major reshape + bf16 cast.
    x2d = x.reshape(B, H, WC).astype(compute_dtype)
    h2d = h.reshape(B, H, WCH).astype(compute_dtype)

    # Block-diagonal weight: for each tap (kh,kw), kron(I_W, w_tap) so the conv
    # contraction happens directly in the lane-dense (H, W*C) layout.
    wx = w_hwio[:, :, :C, :].astype(jnp.float32)      # (KH, KW, C, COUT)
    wh = w_hwio[:, :, C:, :].astype(jnp.float32)      # (KH, KW, CH, COUT)
    eye = jnp.eye(W, dtype=jnp.float32)
    wx_blk = jnp.einsum('wv,hkcd->hkwcvd', eye, wx).reshape(KH, KW, WC, WCOUT)
    wh_blk = jnp.einsum('wv,hkcd->hkwcvd', eye, wh).reshape(KH, KW, WCH, WCOUT)
    # Row order must match the kernel's per-tap [x-window, h-window] concat.
    w_big = jnp.concatenate(
        [jnp.concatenate([wx_blk[i, j], wh_blk[i, j]], axis=0)
         for i in range(KH) for j in range(KW)], axis=0).astype(compute_dtype)
    b_row = jnp.tile(b.astype(jnp.float32), W).reshape(1, WCOUT)

    Hp = H + 2 * ph
    WpC = (W + 2 * pw) * C
    WpCH = (W + 2 * pw) * CH

    kern = functools.partial(_conv_twa_kernel, H=H, W=W, KH=KH, KW=KW, C=C, CH=CH)

    out2d = pl.pallas_call(
        kern,
        out_shape=jax.ShapeDtypeStruct((B, H, WCOUT), x.dtype),
        grid_spec=pltpu.PrefetchScalarGridSpec(
            num_scalar_prefetch=0,
            grid=(B,),
            in_specs=[
                pl.BlockSpec((1, H, WC), lambda bb: (bb, 0, 0)),
                pl.BlockSpec((1, H, WCH), lambda bb: (bb, 0, 0)),
                pl.BlockSpec((KBIG, WCOUT), lambda bb: (0, 0)),   # fetched once
                pl.BlockSpec((1, WCOUT), lambda bb: (0, 0)),
            ],
            out_specs=pl.BlockSpec((1, H, WCOUT), lambda bb: (bb, 0, 0)),
            scratch_shapes=[
                pltpu.VMEM((Hp, WpC), jnp.float32),
                pltpu.VMEM((Hp, WpCH), jnp.float32),
            ],
        ),
        compiler_params=pltpu.CompilerParams(
            dimension_semantics=("parallel",),
            vmem_limit_bytes=32 * 1024 * 1024),
    )(x2d, h2d, w_big, b_row)

    return out2d.reshape(B, H, W, COUT)


def _reference(x, h, w_hwio, b):
    comb = jnp.concatenate([x, h], axis=-1)
    cc = jax.lax.conv_general_dilated(
        comb, w_hwio, window_strides=(1, 1), padding="SAME",
        dimension_numbers=("NHWC", "HWIO", "NHWC"))
    gate = jax.nn.sigmoid(cc + b[None, None, None, :])
    return gate * x + (1.0 - gate) * h


if __name__ == "__main__":
    # Small, self-consistent shapes: batch=2, input_dim=hidden_dim=8,
    # spatial 16x16, kernel 3x3 ('same' padding), bias=True.
    B, H, W = 2, 16, 16
    INPUT_DIM = HIDDEN_DIM = 8
    KH, KW = 3, 3
    CTOT = INPUT_DIM + HIDDEN_DIM

    key = jax.random.PRNGKey(0)
    kx, kh_, kw_, kb = jax.random.split(key, 4)

    x = jax.random.normal(kx, (B, H, W, INPUT_DIM), dtype=jnp.float32)
    h_cur = jax.random.normal(kh_, (B, H, W, HIDDEN_DIM), dtype=jnp.float32)

    # kaiming_normal(mode='fan_out') for Conv2d: std = sqrt(2 / fan_out).
    fan_out = HIDDEN_DIM * KH * KW
    std = float(np.sqrt(2.0 / fan_out))
    w_hwio = std * jax.random.normal(kw_, (KH, KW, CTOT, HIDDEN_DIM),
                                     dtype=jnp.float32)
    b = 0.1 * jax.random.normal(kb, (HIDDEN_DIM,), dtype=jnp.float32)

    out = conv_twa_cell(x, h_cur, w_hwio, b, (KH, KW))
    out = jax.block_until_ready(out)

    # Compare at matched precision: the kernel quantizes activations/weights to
    # bf16 at the pallas_call boundary, so quantize the reference inputs too.
    q = lambda a: a.astype(jnp.bfloat16).astype(jnp.float32)
    ref = jax.block_until_ready(_reference(q(x), q(h_cur), q(w_hwio), b))
    np.testing.assert_allclose(np.asarray(out), np.asarray(ref),
                               rtol=2e-2, atol=2e-2)
    print("KERNEL_OK")
</pallas_src>

<mosaic_0001>
module attributes {stable_mosaic.version = 11 : i64} {
  func.func @_conv_twa_kernel(%arg0: i32, %arg1: memref<1x16x128xbf16, #tpu.memory_space<vmem>>, %arg2: memref<1x16x128xbf16, #tpu.memory_space<vmem>>, %arg3: memref<2304x128xbf16, #tpu.memory_space<vmem>>, %arg4: memref<1x128xf32, #tpu.memory_space<vmem>>, %arg5: memref<1x16x128xf32, #tpu.memory_space<vmem>>, %arg6: memref<18x144xf32, #tpu.memory_space<vmem>>, %arg7: memref<18x144xf32, #tpu.memory_space<vmem>>) attributes {dimension_semantics = [#tpu.dimension_semantics<parallel>], iteration_bounds = array<i64: 2>, scalar_prefetch = 0 : i64, scratch_operands = 2 : i64, tpu.core_type = #tpu.core_type<tc>, window_params = [{transform_indices = @transform_0, window_bounds = array<i64: 1, 16, 128>}, {transform_indices = @transform_1, window_bounds = array<i64: 1, 16, 128>}, {pipeline_mode = #tpu.pipeline_mode<synchronous>, transform_indices = @transform_2, window_bounds = array<i64: 2304, 128>}, {pipeline_mode = #tpu.pipeline_mode<synchronous>, transform_indices = @transform_3, window_bounds = array<i64: 1, 128>}, {transform_indices = @transform_4, window_bounds = array<i64: 1, 16, 128>}]} {
    %cst = arith.constant 0.000000e+00 : f32
    %0 = vector.broadcast %cst : f32 to vector<18x144xf32>
    %c0 = arith.constant 0 : index
    %c0_0 = arith.constant 0 : index
    %1 = vector.load %arg6[%c0, %c0_0] : memref<18x144xf32, #tpu.memory_space<vmem>>, vector<18x144xf32>
    tpu.vector_store %arg6[%c0, %c0_0], %0 {strides = array<i32>} : memref<18x144xf32, #tpu.memory_space<vmem>>, vector<18x144xf32>,
    %cst_1 = arith.constant 0.000000e+00 : f32
    %2 = vector.broadcast %cst_1 : f32 to vector<18x144xf32>
    %c0_2 = arith.constant 0 : index
    %c0_3 = arith.constant 0 : index
    %3 = vector.load %arg7[%c0_2, %c0_3] : memref<18x144xf32, #tpu.memory_space<vmem>>, vector<18x144xf32>
    tpu.vector_store %arg7[%c0_2, %c0_3], %2 {strides = array<i32>} : memref<18x144xf32, #tpu.memory_space<vmem>>, vector<18x144xf32>,
    %c0_4 = arith.constant 0 : index
    %c0_5 = arith.constant 0 : index
    %c0_6 = arith.constant 0 : index
    %4 = vector.load %arg1[%c0_4, %c0_5, %c0_6] : memref<1x16x128xbf16, #tpu.memory_space<vmem>>, vector<1x16x128xbf16>
    %5 = vector.shape_cast %4 : vector<1x16x128xbf16> to vector<16x128xbf16>
    %6 = arith.extf %5 : vector<16x128xbf16> to vector<16x128xf32>
    %c1 = arith.constant 1 : index
    %c8 = arith.constant 8 : index
    %7 = vector.load %arg6[%c1, %c8] : memref<18x144xf32, #tpu.memory_space<vmem>>, vector<16x128xf32>
    tpu.vector_store %arg6[%c1, %c8], %6 {strides = array<i32>} : memref<18x144xf32, #tpu.memory_space<vmem>>, vector<16x128xf32>,
    %c0_7 = arith.constant 0 : index
    %c0_8 = arith.constant 0 : index
    %c0_9 = arith.constant 0 : index
    %8 = vector.load %arg2[%c0_7, %c0_8, %c0_9] : memref<1x16x128xbf16, #tpu.memory_space<vmem>>, vector<1x16x128xbf16>
    %9 = vector.shape_cast %8 : vector<1x16x128xbf16> to vector<16x128xbf16>
    %10 = arith.extf %9 : vector<16x128xbf16> to vector<16x128xf32>
    %c1_10 = arith.constant 1 : index
    %c8_11 = arith.constant 8 : index
    %11 = vector.load %arg7[%c1_10, %c8_11] : memref<18x144xf32, #tpu.memory_space<vmem>>, vector<16x128xf32>
    tpu.vector_store %arg7[%c1_10, %c8_11], %10 {strides = array<i32>} : memref<18x144xf32, #tpu.memory_space<vmem>>, vector<16x128xf32>,
    %c0_12 = arith.constant 0 : index
    %c0_13 = arith.constant 0 : index
    %12 = vector.load %arg6[%c0_12, %c0_13] : memref<18x144xf32, #tpu.memory_space<vmem>>, vector<16x128xf32>
    %c0_14 = arith.constant 0 : index
    %c0_15 = arith.constant 0 : index
    %13 = vector.load %arg7[%c0_14, %c0_15] : memref<18x144xf32, #tpu.memory_space<vmem>>, vector<16x128xf32>
    %c0_16 = arith.constant 0 : index
    %c8_17 = arith.constant 8 : index
    %14 = vector.load %arg6[%c0_16, %c8_17] : memref<18x144xf32, #tpu.memory_space<vmem>>, vector<16x128xf32>
    %c0_18 = arith.constant 0 : index
    %c8_19 = arith.constant 8 : index
    %15 = vector.load %arg7[%c0_18, %c8_19] : memref<18x144xf32, #tpu.memory_space<vmem>>, vector<16x128xf32>
    %c0_20 = arith.constant 0 : index
    %c16 = arith.constant 16 : index
    %16 = vector.load %arg6[%c0_20, %c16] : memref<18x144xf32, #tpu.memory_space<vmem>>, vector<16x128xf32>
    %c0_21 = arith.constant 0 : index
    %c16_22 = arith.constant 16 : index
    %17 = vector.load %arg7[%c0_21, %c16_22] : memref<18x144xf32, #tpu.memory_space<vmem>>, vector<16x128xf32>
    %c1_23 = arith.constant 1 : index
    %c0_24 = arith.constant 0 : index
    %18 = vector.load %arg6[%c1_23, %c0_24] : memref<18x144xf32, #tpu.memory_space<vmem>>, vector<16x128xf32>
    %c1_25 = arith.constant 1 : index
    %c0_26 = arith.constant 0 : index
    %19 = vector.load %arg7[%c1_25, %c0_26] : memref<18x144xf32, #tpu.memory_space<vmem>>, vector<16x128xf32>
    %c1_27 = arith.constant 1 : index
    %c8_28 = arith.constant 8 : index
    %20 = vector.load %arg6[%c1_27, %c8_28] : memref<18x144xf32, #tpu.memory_space<vmem>>, vector<16x128xf32>
    %c1_29 = arith.constant 1 : index
    %c8_30 = arith.constant 8 : index
    %21 = vector.load %arg7[%c1_29, %c8_30] : memref<18x144xf32, #tpu.memory_space<vmem>>, vector<16x128xf32>
    %c1_31 = arith.constant 1 : index
    %c16_32 = arith.constant 16 : index
    %22 = vector.load %arg6[%c1_31, %c16_32] : memref<18x144xf32, #tpu.memory_space<vmem>>, vector<16x128xf32>
    %c1_33 = arith.constant 1 : index
    %c16_34 = arith.constant 16 : index
    %23 = vector.load %arg7[%c1_33, %c16_34] : memref<18x144xf32, #tpu.memory_space<vmem>>, vector<16x128xf32>
    %c2 = arith.constant 2 : index
    %c0_35 = arith.constant 0 : index
    %24 = vector.load %arg6[%c2, %c0_35] : memref<18x144xf32, #tpu.memory_space<vmem>>, vector<16x128xf32>
    %c2_36 = arith.constant 2 : index
    %c0_37 = arith.constant 0 : index
    %25 = vector.load %arg7[%c2_36, %c0_37] : memref<18x144xf32, #tpu.memory_space<vmem>>, vector<16x128xf32>
    %c2_38 = arith.constant 2 : index
    %c8_39 = arith.constant 8 : index
    %26 = vector.load %arg6[%c2_38, %c8_39] : memref<18x144xf32, #tpu.memory_space<vmem>>, vector<16x128xf32>
    %c2_40 = arith.constant 2 : index
    %c8_41 = arith.constant 8 : index
    %27 = vector.load %arg7[%c2_40, %c8_41] : memref<18x144xf32, #tpu.memory_space<vmem>>, vector<16x128xf32>
    %c2_42 = arith.constant 2 : index
    %c16_43 = arith.constant 16 : index
    %28 = vector.load %arg6[%c2_42, %c16_43] : memref<18x144xf32, #tpu.memory_space<vmem>>, vector<16x128xf32>
    %c2_44 = arith.constant 2 : index
    %c16_45 = arith.constant 16 : index
    %29 = vector.load %arg7[%c2_44, %c16_45] : memref<18x144xf32, #tpu.memory_space<vmem>>, vector<16x128xf32>
    %30 = tpu.concatenate %12, %13, %14, %15, %16, %17, %18, %19, %20, %21, %22, %23, %24, %25, %26, %27 in 1 : vector<16x128xf32>, vector<16x128xf32>, vector<16x128xf32>, vector<16x128xf32>, vector<16x128xf32>, vector<16x128xf32>, vector<16x128xf32>, vector<16x128xf32>, vector<16x128xf32>, vector<16x128xf32>, vector<16x128xf32>, vector<16x128xf32>, vector<16x128xf32>, vector<16x128xf32>, vector<16x128xf32>, vector<16x128xf32> -> vector<16x2048xf32>
    %31 = tpu.concatenate %28, %29 in 1 : vector<16x128xf32>, vector<16x128xf32> -> vector<16x256xf32>
    %32 = tpu.concatenate %30, %31 in 1 : vector<16x2048xf32>, vector<16x256xf32> -> vector<16x2304xf32>
    %33 = arith.truncf %32 : vector<16x2304xf32> to vector<16x2304xbf16>
    %c0_46 = arith.constant 0 : index
    %c0_47 = arith.constant 0 : index
    %34 = vector.load %arg3[%c0_46, %c0_47] : memref<2304x128xbf16, #tpu.memory_space<vmem>>, vector<2304x128xbf16>
    %cst_48 = arith.constant dense<0.000000e+00> : vector<16x128xf32>
    %35 = tpu.matmul %33, %34, %cst_48 {dimension_numbers = #tpu.dot_dimension_numbers<[1], [0], [0], [1], [0, 0, 1, 1], [], []>} : vector<16x2304xbf16>, vector<2304x128xbf16>, vector<16x128xf32> -> vector<16x128xf32>
    %c0_49 = arith.constant 0 : index
    %c0_50 = arith.constant 0 : index
    %36 = vector.load %arg4[%c0_49, %c0_50] : memref<1x128xf32, #tpu.memory_space<vmem>>, vector<1x128xf32>
    %37 = vector.broadcast %36 : vector<1x128xf32> to vector<16x128xf32>
    %38 = arith.addf %35, %37 : vector<16x128xf32>
    %39 = arith.negf %38 : vector<16x128xf32>
    %40 = math.exp %39 : vector<16x128xf32>
    %cst_51 = arith.constant 1.000000e+00 : f32
    %41 = vector.broadcast %cst_51 : f32 to vector<16x128xf32>
    %42 = arith.addf %41, %40 : vector<16x128xf32>
    %43 = arith.divf %41, %42 : vector<16x128xf32>
    %c0_52 = arith.constant 0 : index
    %c0_53 = arith.constant 0 : index
    %c0_54 = arith.constant 0 : index
    %44 = vector.load %arg1[%c0_52, %c0_53, %c0_54] : memref<1x16x128xbf16, #tpu.memory_space<vmem>>, vector<1x16x128xbf16>
    %45 = vector.shape_cast %44 : vector<1x16x128xbf16> to vector<16x128xbf16>
    %46 = arith.extf %45 : vector<16x128xbf16> to vector<16x128xf32>
    %c0_55 = arith.constant 0 : index
    %c0_56 = arith.constant 0 : index
    %c0_57 = arith.constant 0 : index
    %47 = vector.load %arg2[%c0_55, %c0_56, %c0_57] : memref<1x16x128xbf16, #tpu.memory_space<vmem>>, vector<1x16x128xbf16>
    %48 = vector.shape_cast %47 : vector<1x16x128xbf16> to vector<16x128xbf16>
    %49 = arith.extf %48 : vector<16x128xbf16> to vector<16x128xf32>
    %50 = arith.mulf %43, %46 : vector<16x128xf32>
    %cst_58 = arith.constant 1.000000e+00 : f32
    %51 = vector.broadcast %cst_58 : f32 to vector<16x128xf32>
    %52 = arith.subf %51, %43 : vector<16x128xf32>
    %53 = arith.mulf %52, %49 : vector<16x128xf32>
    %54 = arith.addf %50, %53 : vector<16x128xf32>
    %c0_59 = arith.constant 0 : index
    %c0_60 = arith.constant 0 : index
    %c0_61 = arith.constant 0 : index
    %55 = vector.load %arg5[%c0_59, %c0_60, %c0_61] : memref<1x16x128xf32, #tpu.memory_space<vmem>>, vector<1x16x128xf32>
    %56 = vector.shape_cast %55 : vector<1x16x128xf32> to vector<16x128xf32>
    %57 = vector.shape_cast %54 : vector<16x128xf32> to vector<1x16x128xf32>
    tpu.vector_store %arg5[%c0_59, %c0_60, %c0_61], %57 {strides = array<i32>} : memref<1x16x128xf32, #tpu.memory_space<vmem>>, vector<1x16x128xf32>,
    return
  }
  func.func @transform_0(%arg0: i32) -> (i32, i32, i32) {
    %c0_i32 = arith.constant 0 : i32
    %c0_i32_0 = arith.constant 0 : i32
    %c0_i32_1 = arith.constant 0 : i32
    return %arg0, %c0_i32, %c0_i32_0 : i32, i32, i32
  }
  func.func @transform_1(%arg0: i32) -> (i32, i32, i32) {
    %c0_i32 = arith.constant 0 : i32
    %c0_i32_0 = arith.constant 0 : i32
    %c0_i32_1 = arith.constant 0 : i32
    return %arg0, %c0_i32, %c0_i32_0 : i32, i32, i32
  }
  func.func @transform_2(%arg0: i32) -> (i32, i32) {
    %c0_i32 = arith.constant 0 : i32
    %c0_i32_0 = arith.constant 0 : i32
    %c0_i32_1 = arith.constant 0 : i32
    return %c0_i32, %c0_i32_0 : i32, i32
  }
  func.func @transform_3(%arg0: i32) -> (i32, i32) {
    %c0_i32 = arith.constant 0 : i32
    %c0_i32_0 = arith.constant 0 : i32
    %c0_i32_1 = arith.constant 0 : i32
    return %c0_i32, %c0_i32_0 : i32, i32
  }
  func.func @transform_4(%arg0: i32) -> (i32, i32, i32) {
    %c0_i32 = arith.constant 0 : i32
    %c0_i32_0 = arith.constant 0 : i32
    %c0_i32_1 = arith.constant 0 : i32
    return %arg0, %c0_i32, %c0_i32_0 : i32, i32, i32
  }
}

</mosaic_0001>

<bundles_post_ra>
// kernel: tpu_custom_call.1
= control target key start
LH: loop header
LB: loop body
LE: loop exit
PB: predicated region body
PF: predicated region fallthrough
CT: control target
= control target key end

     0   :  { %s3730_s0 = inlined_call_operand.hbm [shape: bf16[2,16,128], index: 0, kind: input, shape index: {}]   ;;  %s3731_s1 = inlined_call_operand.hbm [shape: bf16[2,16,128], index: 1, kind: input, shape index: {}]   ;;  %s3732_s2 = inlined_call_operand.hbm [shape: bf16[2304,128], index: 2, kind: input, shape index: {}]   ;;  %s3733_s3 = inlined_call_operand.vmem [shape: f32[1,128], index: 3, kind: input, shape index: {}]   ;;  %s3734_s4 = inlined_call_operand.hbm [shape: f32[2,16,128], index: 4, kind: output, shape index: {}]  }
   0x1   :  { %3739 = sst [smem:[#allocation15_spill]] %s3730_s0 }
   0x2   :  { %3740 = sst [smem:[#allocation16_spill]] %s3732_s2 }
   0x3   :  { %9 = vsyncpa [#allocation5], 0 }
   0x4   :  { %11 = vsyncpa [#allocation5 + $0x1], 0 }
   0x5   :  { %12 = vsyncpa [#allocation8], 0 }
   0x6   :  { %14 = vsyncpa [#allocation8 + $0x1], 0 }
   0x7   :  { %15 = vsyncpa [#allocation6], 0 }
   0x8   :  { %17 = vsyncpa [#allocation6 + $0x1], 0  ;;  %s3375_s15 = smov 0   ;;  %s3377_s16 = smov 0  }
   0x9   :  { %s3379_s17 = smov 0   ;;  %s3381_s18 = smov 0  }
   0xa LB: > { %s3396_s19 = sadd.s32 4294967295, %s3340_s18   ;;  %s2202_s20 = sadd.s32 4294967294, %s3340_s18   ;;  %s3340_s18 = sphi %s3381_s18, %s3754_s18   ;;  %s3336_s17 = sphi %s3379_s17, %s3753_s17   ;;  %s3332_s16 = sphi %s3377_s16, %s3752_s16   ;;  %s3328_s15 = sphi %s3375_s15, %s3751_s15  }
   0xb   : > { %p43_p0 = scmp.ne.s32.totalorder %s3332_s16, %s3328_s15  ;;  %p44_p1 = scmp.eq.s32.totalorder %s3396_s19, 0 }
   0xc   : > { %p135_p2 = scmp.eq.s32.totalorder %s3396_s19, 1  ;;  %p141_p3 = scmp.eq.s32.totalorder %s2202_s20, 1 }
   0xd   : > { %p3405_p4 = por %p44_p1, %p43_p0  ;;  %p2203_p5 = scmp.ge.s32.totalorder %s3340_s18, 1 }
   0xe   : > { %p3410_p6 = por %p141_p3, %p43_p0  ;;  %p148_p7 = scmp.lt.s32.totalorder %s3340_s18, 3 }
   0xf   : > { %s3743_s2 = sld [smem:[#allocation16_spill]]  ;;  %s3342_s27 = smov [#allocation9]  }
  0x10   : > { %p3418_p8 = pnand %p2203_p5, %p148_p7  ;;  %s161_s28 = sshll.u32 %s3342_s27, 4  ;;  %s162_s28 = int_to_ptr.vmem [resolvable:$true] %s161_s28 }
  0x11   : > { %s3428_s29 = sadd.s32 1, %s3340_s18   ;;  %s3735_s30 = smov 64  }
  0x12   : > { %p2973_p9 = pneg %p3418_p8  ;;  %s3737_s5 = smov 4  }
  0x13   : > { %s27_s6 = ssub.s32 %s3340_s18, %s3428_s29  ;;  %s30_s7 = sadd.s32 1, %s3336_s17 }
  0x14   : > { %p2974_p10 = pnand %p2973_p9, %p44_p1  ;;  %p28_p12 = scmp.eq.s32.totalorder %s27_s6, 0 }
  0x15   : > { %s159_s25 = sshll.u32 %s3743_s2, 4  ;;  %p37_p13 = scmp.ne.s32.totalorder %s3336_s17, %s3332_s16  ;;  %s160_s25 = int_to_ptr.hbm [resolvable:$true] %s159_s25 }
  0x16   : > { %2976 = dma.hbm_to_vmem [thread:$0]  (!%p2974_p10), %s160_s25, 18432, %s162_s28, [#allocation8], %s3735_s30, %s3735_s30, %s3737_s5  }
  0x17   : > { %p38_p0 = scmp.eq.s32.totalorder %s3340_s18, 0  ;;  %p2989_p3 = scmp.lt.s32.totalorder %s3340_s18, 2 }
  0x18   : > { %s3441_s8 = scalar_select %p28_p12, %s3336_s17, %s30_s7  }
  0x19   : > { %p39_p5 = por %p38_p0, %p37_p13  ;;  %p3445_p7 = por %p135_p2, %p37_p13 }
  0x1a   : > { %s178_s10 = sand.u32 1, %s3336_s17   ;;  %s2800_s11 = sshll.u32 %s3340_s18, 3 }
  0x1b   : > { %s2206_s12 = sshll.u32 %s178_s10, 3  ;;  %s3746_s0 = sld [smem:[#allocation15_spill]] }
  0x1c   : > { %s182_s24 = scalar_lea.vmem [#allocation4], %s2206_s12  ;;  %p3456_p9 = pnand %p2989_p3, %p39_p5 }
  0x1d   : > { %s190_s25 = sshll.u32 %s182_s24, 4  ;;  %s209_s7 = scalar_lea.hbm %s3731_s1, %s2800_s11  ;;  %s191_s25 = int_to_ptr.vmem [resolvable:$true] %s190_s25 }
  0x1e   : > { %s204_s30 = scalar_lea.vmem [#allocation7], %s2206_s12  ;;  %s210_s13 = sshll.u32 %s209_s7, 4  ;;  %s211_s13 = int_to_ptr.hbm [resolvable:$true] %s210_s13 }
  0x1f   : > { %s3463_s5 = sshll.u32 %s204_s30, 4  ;;  %s179_s14 = scalar_lea.sflag [#allocation5], %s178_s10  ;;  %s213_s5 = int_to_ptr.vmem [resolvable:$true] %s3463_s5 }
  0x20   : > { %p3210_p10 = pneg %p3456_p9 }
  0x21   : > { %s187_s20 = scalar_lea.hbm %s3746_s0, %s2800_s11  ;;  %s3213_s6 = scalar_lea.hbm %s3746_s0, 16 }
  0x22   : > { %s188_s23 = sshll.u32 %s187_s20, 4  ;;  %s189_s23 = int_to_ptr.hbm [resolvable:$true] %s188_s23 }
  0x23   : > { %s3206_s20 = sshra.s32 %s189_s23, 4  ;;  %s3207_s20 = int_to_ptr.hbm [resolvable:$true] %s3206_s20 }
  0x24   : > { %s3208_s24 = scalar_lea.hbm %s3207_s20, 8  ;;  %p3214_p0 = scmp.lt.s32.totalorder %s3207_s20, %s3746_s0 }
  0x25   : > { %p3209_p2 = scmp.ne.s32.totalorder %s3207_s20, %s3208_s24  ;;  %p3215_p3 = scmp.lt.s32.totalorder %s3213_s6, %s3208_s24 }
  0x27   : > { %p3211_p12 = pnand %p3210_p10, %p3209_p2  ;;  %p3216_p5 = por %p3215_p3, %p3214_p0 }
  0x29   : > { %p3212_p13 = pneg %p3211_p12 }
  0x2b   : > { %p3217_p11 = pnand %p3216_p5, %p3212_p13 }
  0x2d   : > { %3220 = shalt.err (!%p3217_p11)
}
  0x2e   : > { %s3748_s30 = smov 4   ;;  %s3749_s10 = smov 64  }
  0x2f   : > { %2980 = dma.hbm_to_vmem [thread:$0]  (!%p3456_p9), %s189_s23, 128, %s191_s25, %s179_s14, %s3749_s10, %s3749_s10, %s3748_s30  }
  0x30   : > { %s200_s2 = sand.u32 1, %s3340_s18   ;;  %s3236_s28 = sshra.s32 %s211_s13, 4  ;;  %s3237_s28 = int_to_ptr.hbm [resolvable:$true] %s3236_s28 }
  0x31   : > { %s201_s7 = scalar_lea.sflag [#allocation8], %s200_s2  ;;  %s3238_s20 = scalar_lea.hbm %s3237_s28, 8 }
  0x32   : > { %p3239_p2 = scmp.ne.s32.totalorder %s3237_s28, %s3238_s20  ;;  %s3243_s11 = scalar_lea.hbm %s3731_s1, 16 }
  0x33   : > { %p3244_p13 = scmp.lt.s32.totalorder %s3237_s28, %s3731_s1  ;;  %p3245_p0 = scmp.lt.s32.totalorder %s3243_s11, %s3238_s20 }
  0x34   : > { %p3241_p11 = pnand %p3239_p2, %p3210_p10 }
  0x35   : > { %p3246_p3 = por %p3245_p0, %p3244_p13 }
  0x36   : > { %p3242_p12 = pneg %p3241_p11 }
  0x38   : > { %p3247_p5 = pnand %p3246_p3, %p3242_p12 }
  0x3a   : > { %3250 = shalt.err (!%p3247_p5)
}
  0x3b   : > { %2983 = dma.hbm_to_vmem [thread:$0]  (!%p3456_p9), %s211_s13, 128, %s213_s5, %s201_s7, %s3749_s10, %s3749_s10, %s3748_s30  }
  0x3c   : > { %224 = sbr.rel (%p3418_p8) target bundleno = 586 (0x24a), region = 36  ;;  %s3500_s23 = sand.u32 (!%p3418_p8), 1, %s3332_s16  }
  0x3d   : > { %s2213_s0 = sshll.u32 (!%p3418_p8), %s3500_s23, 3  ;;  %s227_s25 = scalar_lea.sflag (!%p3418_p8), [#allocation5], %s3500_s23 }
  0x3e   : > { %s3504_s14 = scalar_lea.vmem (!%p3418_p8), [#allocation4], %s2213_s0 }
  0x41   : > { %3311 = dma.done.wait (%p3405_p4), %s227_s25, 128  }
  0x42   : > { %3313 = vsyncadd (%p3405_p4), %s227_s25, 4294967168  ;;  %s236_s5 = sand.u32 1, %s3396_s19   ;;  %s3511_s27 = scalar_lea.vmem [#allocation7], %s2213_s0 }
  0x43   : > { %s237_s26 = scalar_lea.sflag [#allocation8], %s236_s5 }
  0x44   : > { %3315 = dma.done.wait (%p3405_p4), %s237_s26, 128  }
  0x45   : > { %3317 = vsyncadd (%p3405_p4), %s237_s26, 4294967168 }
  0x46   : > { %3319 = dma.done.wait (%p44_p1), [#allocation8], 18432  }
  0x47   : > { %3321 = vsyncadd (%p44_p1), [#allocation8], 4294948864  ;;  %vm282_vm0 = vcmask 123904   ;;  %v3345_v0 = vmov 0.0   ;;  %v2948_v1 = vld [vmem:[%s3504_s14] sm:$0xff]   ;;  %v2952_v2 = vld [vmem:[%s3511_s27] sm:$0xff]  }
  0x48   : > { %281 = vst [vmem:[#allocation2 + $0x20] sm:$0x3] %v3345_v0  ;;  %v2809_v3 = vld [vmem:[#allocation9 + $0x38] sm:$0xff]  ;;  %v2950_v4 = vunpack.c.h.bf16 %v2948_v1  ;;  %v2953_v5 = vunpack.c.l.bf16 %v2952_v2  ;;  %v2954_v6 = vunpack.c.h.bf16 %v2952_v2  ;;  %v2949_v7 = vunpack.c.l.bf16 %v2948_v1  ;;  %v2808_v9 = vld [vmem:[#allocation9 + $0x30] sm:$0xff]  ;;  %v2807_v18 = vld [vmem:[#allocation9 + $0x28] sm:$0xff]  ;;  %s3346_s21 = smov 8  }
  0x49   : > { %283 = vst.msk [vmem:[#allocation2 + $0x28] sm:$0x3] %vm282_vm0, %v3345_v0  ;;  %v2817_v8 = vld [vmem:[#allocation9 + $0x78] sm:$0xff]  ;;  %vm296_vm1 = vcmask 1040384   ;;  %1773 = vmatpush.bf16.msra.mxu0 %v2809_v3  ;;  %v2816_v13 = vld [vmem:[#allocation9 + $0x70] sm:$0xff]  ;;  %v2815_v19 = vld [vmem:[#allocation9 + $0x68] sm:$0xff] }
  0x4a   : > { %288 = vst [vmem:[#allocation3 + $0x20] sm:$0x3] %v3345_v0  ;;  %v298_v10 = vrot.slane %v2950_v4, 7  ;;  %v328_v11 = vrot.slane %v2954_v6, 7  ;;  %v297_v12 = vrot.slane %v2949_v7, 7  ;;  %1787 = vmatpush.bf16.msra.mxu1 %v2817_v8  ;;  %v327_v16 = vrot.slane %v2953_v5, 7 }
  0x4b   : > { %289 = vst.msk [vmem:[#allocation3 + $0x28] sm:$0x3] %vm282_vm0, %v3345_v0  ;;  %v2806_v21 = vld [vmem:[#allocation9 + $0x20] sm:$0xff]  ;;  %v2805_v23 = vld [vmem:[#allocation9 + $0x18] sm:$0xff]  ;;  %vm277_vm2 = vcmask 130048   ;;  %v2804_v24 = vld [vmem:[#allocation9 + $0x10] sm:$0xff] }
  0x4c   : > { %276 = vst [vmem:[#allocation2] sm:$0xff] %v3345_v0  ;;  %v3042_v14 = vpack.i.bf16 %v328_v11, %v298_v10  ;;  %v299_v15 = vsel %vm296_vm1, %v297_v12, %v298_v10  ;;  %v329_v20 = vsel %vm296_vm1, %v327_v16, %v328_v11  ;;  %v2814_v25 = vld [vmem:[#allocation9 + $0x60] sm:$0xff]  ;;  %v2803_v26 = vld [vmem:[#allocation9 + $0x8] sm:$0xff]  ;;  %v2813_v27 = vld [vmem:[#allocation9 + $0x58] sm:$0xff]  ;;  %vm317_vm3 = vcmask 1040448   ;;  %s3347_s13 = smov 120  }
  0x4d   : > { %279 = vst [vmem:[#allocation2 + $0x10] sm:$0xff] %v3345_v0  ;;  %v3032_v17 = vpack.i.bf16 %v299_v15, %v297_v12  ;;  %1774 = vmatpush.bf16.msra.mxu0 %v2808_v9  ;;  %v3037_v22 = vpack.i.bf16 %v329_v20, %v327_v16  ;;  %v2802_v28 = vld [vmem:[#allocation9] sm:$0xff]  ;;  %v2812_v29 = vld [vmem:[#allocation9 + $0x50] sm:$0xff]  ;;  %v2811_v30 = vld [vmem:[#allocation9 + $0x48] sm:$0xff]  ;;  %vm319_vm4 = vcmask 57344   ;;  %vm309_vm5 = vcmask 1047617  }
  0x4e   : > { %284 = vst [vmem:[#allocation3] sm:$0xff] %v3345_v0  ;;  %3043 = vrot.lane.b32.xlu1 %v3042_v14, %s3346_s21  ;;  %1788 = vmatpush.bf16.msra.mxu1 %v2816_v13  ;;  %v2810_v31 = vld [vmem:[#allocation9 + $0x40] sm:$0xff]  ;;  %vm311_vm6 = vcmask 64513   ;;  %vm313_vm7 = vcmask 1047616   ;;  %vm315_vm8 = vcmask 64512   ;;  %vm429_vm9 = vcmask 1046528  }
  0x4f   : > { %286 = vst [vmem:[#allocation3 + $0x10] sm:$0xff] %v3345_v0  ;;  %3033 = vrot.lane.b32.xlu0 %v3032_v17, %s3346_s21  ;;  %vm510_vm10 = vcmask 1045504   ;;  %s3348_s30 = smov 112   ;;  %vm381_vm11 = vcmask 982016   ;;  %vm410_vm12 = vcmask 916480   ;;  %s2216_s7 = sshll.u32 %s3500_s23, 4 }
  0x50   : > { %278 = vst.msk [vmem:[#allocation2 + $0x8] sm:$0xff] %vm277_vm2, %v3345_v0  ;;  %s2946_s28 = sshll.u32 %s3396_s19, 4  ;;  %s275_s20 = scalar_lea.vmem [#allocation10], %s2216_s7 }
  0x51   : > { %1775 = vmatpush.bf16.msra.mxu0 %v2807_v18  ;;  %280 = vst.msk [vmem:[#allocation2 + $0x18] sm:$0xff] %vm277_vm2, %v3345_v0  ;;  %s2093_s11 = scalar_lea.hbm %s3734_s4, %s2946_s28  ;;  %s2094_s19 = sshll.u32 %s275_s20, 4  ;;  %s2095_s19 = int_to_ptr.vmem [resolvable:$true] %s2094_s19 }
  0x52   : > { %1789 = vmatpush.bf16.msra.mxu1 %v2815_v19  ;;  %285 = vst.msk [vmem:[#allocation3 + $0x8] sm:$0xff] %vm277_vm2, %v3345_v0  ;;  %s2096_s12 = sshll.u32 %s2093_s11, 4  ;;  %s2082_s0 = scalar_lea.sflag [#allocation6], %s3500_s23  ;;  %s2097_s12 = int_to_ptr.hbm [resolvable:$true] %s2096_s12 }
  0x53   : > { %287 = vst.msk [vmem:[#allocation3 + $0x18] sm:$0xff] %vm277_vm2, %v3345_v0  ;;  %s3280_s25 = sshra.s32 %s2097_s12, 4  ;;  %s3281_s25 = int_to_ptr.hbm [resolvable:$true] %s3280_s25 }
  0x54   : > { %p3287_p9 = scmp.lt.s32.totalorder %s3281_s25, %s3734_s4 }
  0x55   : > { %1776 = vmatpush.bf16.msra.mxu0 %v2806_v21 }
  0x56   : > { %1790 = vmatpush.bf16.msra.mxu1 %v2814_v25 }
  0x57   : > { %3038 = vrot.lane.b32.xlu0 %v3037_v22, %s3346_s21 }
  0x59   : > { %1777 = vmatpush.bf16.msra.mxu0 %v2805_v23 }
  0x5a   : > { %1791 = vmatpush.bf16.msra.mxu1 %v2813_v27 }
  0x5d   : > { %1778 = vmatpush.bf16.msra.mxu0 %v2804_v24 }
  0x5e   : > { %1792 = vmatpush.bf16.msra.mxu1 %v2812_v29 }
  0x61   : > { %1779 = vmatpush.bf16.msra.mxu0 %v2803_v26 }
  0x62   : > { %1793 = vmatpush.bf16.msra.mxu1 %v2811_v30 }
  0x65   : > { %1780 = vmatpush.bf16.msra.mxu0 %v2802_v28 }
  0x66   : > { %1794 = vmatpush.bf16.msra.mxu1 %v2810_v31 }
  0xc0   : > { %v3044_v32 = vpop.permute.xlu1 %3043 }
  0xc1   : > { %v3046_v33 = vunpack.i.h.bf16 %v3044_v32  ;;  %v3045_v34 = vunpack.i.l.bf16 %v3044_v32  ;;  %v3034_v35 = vpop.permute.xlu0 %3033 }
  0xc2   : > { %v3035_v36 = vunpack.i.l.bf16 %v3034_v35  ;;  %v3036_v37 = vunpack.i.h.bf16 %v3034_v35 }
  0xc3   : > { %318 = vst.msk [vmem:[#allocation2 + $0x20] sm:$0x1] %vm317_vm3, %v3045_v34 }
  0xc4   : > { %320 = vst.msk [vmem:[#allocation2 + $0x28] sm:$0x1] %vm319_vm4, %v3045_v34 }
  0xc5   : > { %343 = vst.msk [vmem:[#allocation3 + $0x20] sm:$0x1] %vm317_vm3, %v3046_v33 }
  0xc6   : > { %344 = vst.msk [vmem:[#allocation3 + $0x28] sm:$0x1] %vm319_vm4, %v3046_v33 }
  0xc7   : > { %310 = vst.msk [vmem:[#allocation2] sm:$0xfe] %vm309_vm5, %v3035_v36 }
  0xc8   : > { %312 = vst.msk [vmem:[#allocation2 + $0x8] sm:$0xfe] %vm311_vm6, %v3035_v36 }
  0xc9   : > { %314 = vst.msk [vmem:[#allocation2 + $0x10] sm:$0xff] %vm313_vm7, %v3036_v37  ;;  %v3039_v38 = vpop.permute.xlu0 %3038 }
  0xca   : > { %316 = vst.msk [vmem:[#allocation2 + $0x18] sm:$0xff] %vm315_vm8, %v3036_v37  ;;  %v3041_v39 = vunpack.i.h.bf16 %v3039_v38  ;;  %v3040_v40 = vunpack.i.l.bf16 %v3039_v38  ;;  %v3530_v47 = vld [vmem:[#allocation2 + $0x20] sm:$0x3] }
  0xcb   : > { %v354_v51 = vld [vmem:[#allocation2 + $0x20] sm:$0x1]  ;;  %v514_v55 = vrot.slane %v3530_v47, 2  ;;  %v358_v19 = vld [vmem:[#allocation2 + $0x28] sm:$0x1] }
  0xcc   : > { %339 = vst.msk [vmem:[#allocation3] sm:$0xfe] %vm309_vm5, %v3040_v40  ;;  %v356_v54 = vld [vmem:[#allocation3 + $0x20] sm:$0x1]  ;;  %v433_v63 = vrot.slane %v354_v51, 1  ;;  %v451_v26 = vrot.slane %v358_v19, 1 }
  0xcd   : > { %340 = vst.msk [vmem:[#allocation3 + $0x8] sm:$0xfe] %vm311_vm6, %v3040_v40  ;;  %v442_v6 = vrot.slane %v356_v54, 1  ;;  %v3552_v11 = vld [vmem:[#allocation3 + $0x20] sm:$0x3]  ;;  %v2823_v54 = vld [vmem:[#allocation9 + $0xa8] sm:$0xff] }
  0xce   : > { %341 = vst.msk [vmem:[#allocation3 + $0x10] sm:$0xff] %vm313_vm7, %v3041_v39  ;;  %v345_v41 = vld [vmem:[#allocation2] sm:$0xff]  ;;  %v523_v18 = vrot.slane %v3552_v11, 2  ;;  %v360_v36 = vld [vmem:[#allocation3 + $0x28] sm:$0x1] }
  0xcf   : > { %342 = vst.msk [vmem:[#allocation3 + $0x18] sm:$0xff] %vm315_vm8, %v3041_v39  ;;  %v349_v42 = vld [vmem:[#allocation2 + $0x8] sm:$0xff]  ;;  %v3534_v49 = vld [vmem:[#allocation2] sm:$0xfc]  ;;  %v470_v38 = vrot.slane %v360_v36, 1  ;;  %v2825_v39 = vld [vmem:[#allocation9 + $0xb8] sm:$0xff] }
  0xd0   : > { %v346_v43 = vld [vmem:[#allocation2 + $0x10] sm:$0xff]  ;;  %v3047_v44 = vpack.i.bf16 %v349_v42, %v345_v41  ;;  %v353_v52 = vld [vmem:[#allocation2] sm:$0xfe]  ;;  %v511_v58 = vrot.slane %v3534_v49, 2  ;;  %v357_v27 = vld [vmem:[#allocation2 + $0x8] sm:$0xfe]  ;;  %1801 = vmatpush.bf16.msra.mxu2 %v2825_v39 }
  0xd1   : > { %v3528_v45 = vld [vmem:[#allocation2 + $0x18] sm:$0xff]  ;;  %v599_v46 = vpack.c.bf16 %v346_v43, %v345_v41  ;;  %v512_v59 = vrot.slane %v346_v43, 2  ;;  %v430_v0 = vrot.slane %v353_v52, 1  ;;  %v431_v2 = vrot.slane %v346_v43, 1  ;;  %v3597_v40 = vld [vmem:[#allocation2 + $0x8] sm:$0xfc] }
  0xd2   : > { %v3052_v48 = vpack.i.bf16 %v3528_v45, %v346_v43  ;;  %3048 = vrot.lane.b32.xlu1 %v3047_v44, %s3347_s13  ;;  %v449_v25 = vrot.slane %v3528_v45, 1  ;;  %v448_v30 = vrot.slane %v357_v27, 1  ;;  %v529_v42 = vrot.slane %v3597_v40, 2  ;;  %v2841_v52 = vld [vmem:[#allocation9 + $0x138] sm:$0xff]  ;;  %v2830_v19 = vld [vmem:[#allocation9 + $0xe0] sm:$0xff]  ;;  %v2835_v39 = vld [vmem:[#allocation9 + $0x108] sm:$0xff] }
  0xd3   : > { %1781 = vmatmul.bf16.vlgmr.msra.gmra.mxu0 %v599_v46  ;;  %v347_v50 = vld [vmem:[#allocation3] sm:$0xff]  ;;  %v3547_v8 = vsel %vm510_vm10, %v511_v58, %v512_v59  ;;  %v3550_v10 = vsel %vm510_vm10, %v512_v59, %v514_v55  ;;  %v3556_v12 = vsel %vm429_vm9, %v431_v2, %v433_v63  ;;  %v3559_v13 = vsel %vm429_vm9, %v430_v0, %v431_v2 }
  0xd4   : > { %3053 = vrot.lane.b32.xlu2 %v3052_v48, %s3347_s13  ;;  %v355_v53 = vld [vmem:[#allocation3] sm:$0xfe]  ;;  %v351_v57 = vld [vmem:[#allocation3 + $0x8] sm:$0xff]  ;;  %v611_v17 = vpack.c.bf16 %v3550_v10, %v3547_v8  ;;  %v605_v23 = vpack.c.bf16 %v3556_v12, %v3559_v13  ;;  %v452_v31 = vsel %vm429_vm9, %v449_v25, %v451_v26  ;;  %v450_v34 = vsel %vm429_vm9, %v448_v30, %v449_v25  ;;  %v2846_v26 = vld [vmem:[#allocation9 + $0x160] sm:$0xff] }
  0xd5   : > { %v348_v56 = vld [vmem:[#allocation3 + $0x10] sm:$0xff]  ;;  %v3539_v60 = vld [vmem:[#allocation3] sm:$0xfc]  ;;  %v439_v3 = vrot.slane %v355_v53, 1  ;;  %v3057_v5 = vpack.i.bf16 %v351_v57, %v347_v50  ;;  %v359_v20 = vld [vmem:[#allocation3 + $0x8] sm:$0xfe]  ;;  %v3092_v33 = vpack.i.bf16 %v452_v31, %v3556_v12  ;;  %v3087_v37 = vpack.i.bf16 %v450_v34, %v3559_v13  ;;  %1829 = vmatpush.bf16.msrb.mxu0 %v2841_v52 }
  0xd6   : > { %v3541_v61 = vld [vmem:[#allocation3 + $0x18] sm:$0xff]  ;;  %v600_v62 = vpack.c.bf16 %v348_v56, %v347_v50  ;;  %v440_v4 = vrot.slane %v348_v56, 1  ;;  %v520_v7 = vrot.slane %v3539_v60, 2  ;;  %v521_v9 = vrot.slane %v348_v56, 2  ;;  %v2824_v46 = vld [vmem:[#allocation9 + $0xb0] sm:$0xff]  ;;  %v2837_v30 = vld [vmem:[#allocation9 + $0x118] sm:$0xff] }
  0xd7   : > { %v3067_v1 = vpack.i.bf16 %v3541_v61, %v348_v56  ;;  %v467_v28 = vrot.slane %v359_v20, 1  ;;  %v468_v29 = vrot.slane %v3541_v61, 1  ;;  %v530_v43 = vrot.slane %v3528_v45, 2  ;;  %v3607_v51 = vld [vmem:[#allocation3 + $0x8] sm:$0xfc]  ;;  %1802 = vmatpush.bf16.msra.mxu2 %v2824_v46  ;;  %v2832_v45 = vld [vmem:[#allocation9 + $0xf0] sm:$0xff] }
  0xd8   : > { %1795 = vmatmul.bf16.vlgmr.msra.gmra.mxu1 %v600_v62  ;;  %v3562_v14 = vsel %vm429_vm9, %v439_v3, %v440_v4  ;;  %v3566_v15 = vsel %vm429_vm9, %v440_v4, %v442_v6  ;;  %v3569_v16 = vsel %vm510_vm10, %v520_v7, %v521_v9  ;;  %v3575_v21 = vsel %vm510_vm10, %v521_v9, %v523_v18  ;;  %v3609_v53 = vld [vmem:[#allocation3 + $0x28] sm:$0x3]  ;;  %v2840_v55 = vld [vmem:[#allocation9 + $0x130] sm:$0xff]  ;;  %v366_v62 = vld [vmem:[#allocation2 + $0x28] sm:$0x3] }
  0xd9   : > { %3068 = vrot.lane.b32.xlu0 %v3067_v1, %s3347_s13  ;;  %v612_v22 = vpack.c.bf16 %v3575_v21, %v3569_v16  ;;  %v606_v24 = vpack.c.bf16 %v3566_v15, %v3562_v14  ;;  %v469_v32 = vsel %vm429_vm9, %v467_v28, %v468_v29  ;;  %v471_v41 = vsel %vm429_vm9, %v468_v29, %v470_v38  ;;  %v2849_v56 = vld [vmem:[#allocation9 + $0x178] sm:$0xff]  ;;  %v2848_v0 = vld [vmem:[#allocation9 + $0x170] sm:$0xff]  ;;  %v2831_v3 = vld [vmem:[#allocation9 + $0xe8] sm:$0xff] }
  0xda   : > { %3063 = vrot.lane.b32.xlu1 %v3047_v44, %s3348_s30  ;;  %v3097_v35 = vpack.i.bf16 %v469_v32, %v3562_v14  ;;  %v3102_v44 = vpack.i.bf16 %v471_v41, %v3566_v15  ;;  %v531_v50 = vsel %vm510_vm10, %v529_v42, %v530_v43  ;;  %v548_v58 = vrot.slane %v3607_v51, 2  ;;  %1843 = vmatpush.bf16.msrb.mxu1 %v2849_v56  ;;  %v2839_v4 = vld [vmem:[#allocation9 + $0x128] sm:$0xff]  ;;  %v2821_v7 = vld [vmem:[#allocation9 + $0x98] sm:$0xff]  ;;  %v2838_v20 = vld [vmem:[#allocation9 + $0x120] sm:$0xff] }
  0xdb   : > { %v3127_v57 = vpack.i.bf16 %v531_v50, %v3547_v8  ;;  %v549_v59 = vrot.slane %v3541_v61, 2  ;;  %v551_v63 = vrot.slane %v3609_v53, 2  ;;  %1803 = vmatpush.bf16.msra.mxu2 %v2823_v54  ;;  %v532_v2 = vrot.slane %v366_v62, 2  ;;  %1830 = vmatpush.bf16.msrb.mxu0 %v2840_v55  ;;  %v2847_v6 = vld [vmem:[#allocation9 + $0x168] sm:$0xff]  ;;  %v2820_v28 = vld [vmem:[#allocation9 + $0x90] sm:$0xff]  ;;  %v2829_v29 = vld [vmem:[#allocation9 + $0xd8] sm:$0xff] }
  0xdc   : > { %3058 = vrot.lane.b32.xlu2 %v3057_v5, %s3347_s13  ;;  %v2819_v31 = vld [vmem:[#allocation9 + $0x88] sm:$0xff]  ;;  %v3152_v32 = vpack.i.bf16 %v366_v62, %v3530_v47  ;;  %v2836_v34 = vld [vmem:[#allocation9 + $0x110] sm:$0xff]  ;;  %v3137_v36 = vpack.i.bf16 %v3597_v40, %v3534_v49  ;;  %v2857_v47 = vld [vmem:[#allocation9 + $0x1b8] sm:$0xff]  ;;  %v3162_v49 = vpack.i.bf16 %v3609_v53, %v3552_v11 }
  0xdd   : > { %v550_v61 = vsel %vm510_vm10, %v548_v58, %v549_v59  ;;  %v533_v18 = vsel %vm510_vm10, %v530_v43, %v532_v2  ;;  %v2827_v38 = vld [vmem:[#allocation9 + $0xc8] sm:$0xff]  ;;  %v2845_v41 = vld [vmem:[#allocation9 + $0x158] sm:$0xff]  ;;  %v2826_v42 = vld [vmem:[#allocation9 + $0xc0] sm:$0xff] }
  0xde   : > { %1844 = vmatpush.bf16.msrb.mxu1 %v2848_v0  ;;  %v3142_v9 = vpack.i.bf16 %v550_v61, %v3569_v16  ;;  %v3132_v27 = vpack.i.bf16 %v533_v18, %v3550_v10  ;;  %v2834_v40 = vld [vmem:[#allocation9 + $0x100] sm:$0xff]  ;;  %v2844_v43 = vld [vmem:[#allocation9 + $0x150] sm:$0xff]  ;;  %v2865_v46 = vld [vmem:[#allocation9 + $0x1f8] sm:$0xff] }
  0xdf   : > { %1831 = vmatpush.bf16.msrb.mxu0 %v2839_v4  ;;  %v2843_v50 = vld [vmem:[#allocation9 + $0x148] sm:$0xff]  ;;  %v2864_v52 = vld [vmem:[#allocation9 + $0x1f0] sm:$0xff]  ;;  %v2842_v53 = vld [vmem:[#allocation9 + $0x140] sm:$0xff] }
  0xe0   : > { %v2872_v11 = vld [vmem:[#allocation9 + $0x230] sm:$0xff]  ;;  %v2853_v54 = vld [vmem:[#allocation9 + $0x198] sm:$0xff]  ;;  %v2871_v55 = vld [vmem:[#allocation9 + $0x228] sm:$0xff] }
  0xe1   : > { %3073 = vrot.lane.b32.xlu0 %v3057_v5, %s3348_s30  ;;  %v552_v5 = vsel %vm510_vm10, %v549_v59, %v551_v63  ;;  %v2881_v56 = vld [vmem:[#allocation9 + $0x278] sm:$0xff]  ;;  %v2862_v58 = vld [vmem:[#allocation9 + $0x1e0] sm:$0xff]  ;;  %v2880_v62 = vld [vmem:[#allocation9 + $0x270] sm:$0xff] }
  0xe2   : > { %3083 = vrot.lane.b32.xlu1 %v3067_v1, %s3348_s30  ;;  %v2822_v1 = vld [vmem:[#allocation9 + $0xa0] sm:$0xff]  ;;  %v3147_v25 = vpack.i.bf16 %v552_v5, %v3575_v21  ;;  %1845 = vmatpush.bf16.msrb.mxu1 %v2847_v6  ;;  %v2851_v63 = vld [vmem:[#allocation9 + $0x188] sm:$0xff]  ;;  %v2861_v0 = vld [vmem:[#allocation9 + $0x1d8] sm:$0xff] }
  0xe3   : > { %1804 = vmatpush.bf16.msra.mxu2 %v2822_v1  ;;  %1832 = vmatpush.bf16.msrb.mxu0 %v2838_v20  ;;  %v2870_v59 = vld [vmem:[#allocation9 + $0x220] sm:$0xff]  ;;  %v2869_v1 = vld [vmem:[#allocation9 + $0x218] sm:$0xff]  ;;  %v2879_v2 = vld [vmem:[#allocation9 + $0x268] sm:$0xff] }
  0xe4   : > { %3078 = vrot.lane.b32.xlu2 %v3052_v48, %s3348_s30  ;;  %v2833_v48 = vld [vmem:[#allocation9 + $0xf8] sm:$0xff]  ;;  %v2860_v4 = vld [vmem:[#allocation9 + $0x1d0] sm:$0xff]  ;;  %v2878_v5 = vld [vmem:[#allocation9 + $0x260] sm:$0xff] }
  0xe5   : > { %1815 = vmatpush.bf16.msra.mxu3 %v2833_v48  ;;  %v2873_v48 = vld [vmem:[#allocation9 + $0x238] sm:$0xff]  ;;  %v2868_v61 = vld [vmem:[#allocation9 + $0x210] sm:$0xff]  ;;  %v2859_v6 = vld [vmem:[#allocation9 + $0x1c8] sm:$0xff] }
  0xe6   : > { %1846 = vmatpush.bf16.msrb.mxu1 %v2846_v26  ;;  %v2858_v18 = vld [vmem:[#allocation9 + $0x1c0] sm:$0xff]  ;;  %v2875_v26 = vld [vmem:[#allocation9 + $0x248] sm:$0xff]  ;;  %v2893_v13 = vld [vmem:[#allocation9 + $0x2d8] sm:$0xff] }
  0xe7   : > { %1805 = vmatpush.bf16.msra.mxu2 %v2821_v7  ;;  %1833 = vmatpush.bf16.msrb.mxu0 %v2837_v30  ;;  %v2867_v7 = vld [vmem:[#allocation9 + $0x208] sm:$0xff]  ;;  %v2866_v20 = vld [vmem:[#allocation9 + $0x200] sm:$0xff]  ;;  %v2921_v15 = vld [vmem:[#allocation9 + $0x3b8] sm:$0xff] }
  0xe8   : > { %v2883_v12 = vld [vmem:[#allocation9 + $0x288] sm:$0xff]  ;;  %v2934_v8 = vld [vmem:[#allocation9 + $0x420] sm:$0xff]  ;;  %v2944_v10 = vld [vmem:[#allocation9 + $0x470] sm:$0xff] }
  0xe9   : > { %3093 = vrot.lane.b32.xlu0 %v3092_v33, %s3347_s13  ;;  %1816 = vmatpush.bf16.msra.mxu3 %v2832_v45  ;;  %v2863_v45 = vld [vmem:[#allocation9 + $0x1e8] sm:$0xff]  ;;  %v2914_v16 = vld [vmem:[#allocation9 + $0x380] sm:$0xff]  ;;  %v2924_v21 = vld [vmem:[#allocation9 + $0x3d0] sm:$0xff] }
  0xea   : > { %3098 = vrot.lane.b32.xlu1 %v3097_v35, %s3347_s13  ;;  %1847 = vmatpush.bf16.msrb.mxu1 %v2845_v41 }
  0xeb   : > { %1806 = vmatpush.bf16.msra.mxu2 %v2820_v28  ;;  %1834 = vmatpush.bf16.msrb.mxu0 %v2836_v34 }
  0xec   : > { %3088 = vrot.lane.b32.xlu2 %v3087_v37, %s3347_s13 }
  0xed   : > { %1817 = vmatpush.bf16.msra.mxu3 %v2831_v3  ;;  %v2850_v3 = vld [vmem:[#allocation9 + $0x180] sm:$0xff] }
  0xee   : > { %1848 = vmatpush.bf16.msrb.mxu1 %v2844_v43 }
  0xef   : > { %1807 = vmatpush.bf16.msra.mxu2 %v2819_v31  ;;  %1835 = vmatpush.bf16.msrb.mxu0 %v2835_v39 }
  0xf1   : > { %3108 = vrot.lane.b32.xlu0 %v3087_v37, %s3348_s30  ;;  %1818 = vmatpush.bf16.msra.mxu3 %v2830_v19  ;;  %v2818_v37 = vld [vmem:[#allocation9 + $0x80] sm:$0xff] }
  0xf2   : > { %3113 = vrot.lane.b32.xlu1 %v3092_v33, %s3348_s30  ;;  %v2828_v33 = vld [vmem:[#allocation9 + $0xd0] sm:$0xff]  ;;  %1849 = vmatpush.bf16.msrb.mxu1 %v2843_v50 }
  0xf3   : > { %1808 = vmatpush.bf16.msra.mxu2 %v2818_v37  ;;  %1836 = vmatpush.bf16.msrb.mxu0 %v2834_v40 }
  0xf4   : > { %3103 = vrot.lane.b32.xlu2 %v3102_v44, %s3347_s13 }
  0xf5   : > { %1819 = vmatpush.bf16.msra.mxu3 %v2829_v29 }
  0xf6   : > { %1850 = vmatpush.bf16.msrb.mxu1 %v2842_v53 }
  0xf7   : > { %1857 = vmatpush.bf16.msrb.mxu2 %v2857_v47  ;;  %1885 = vmatpush.bf16.msra.mxu0 %v2873_v48 }
  0xf9   : > { %3123 = vrot.lane.b32.xlu0 %v3102_v44, %s3348_s30  ;;  %1820 = vmatpush.bf16.msra.mxu3 %v2828_v33  ;;  %v2855_v44 = vld [vmem:[#allocation9 + $0x1a8] sm:$0xff] }
  0xfa   : > { %3128 = vrot.lane.b32.xlu1 %v3127_v57, %s3347_s13  ;;  %v2852_v57 = vld [vmem:[#allocation9 + $0x190] sm:$0xff]  ;;  %1899 = vmatpush.bf16.msra.mxu1 %v2881_v56 }
  0xfb   : > { %1886 = vmatpush.bf16.msra.mxu0 %v2872_v11 }
  0xfc   : > { %3118 = vrot.lane.b32.xlu2 %v3097_v35, %s3348_s30  ;;  %v3157_v35 = vpack.i.bf16 %v3607_v51, %v3539_v60  ;;  %v2856_v60 = vld [vmem:[#allocation9 + $0x1b0] sm:$0xff]  ;;  %v2854_v51 = vld [vmem:[#allocation9 + $0x1a0] sm:$0xff] }
  0xfd   : > { %1821 = vmatpush.bf16.msra.mxu3 %v2827_v38  ;;  %1858 = vmatpush.bf16.msrb.mxu2 %v2856_v60 }
  0xfe   : > { %1900 = vmatpush.bf16.msra.mxu1 %v2880_v62  ;;  %v2886_v62 = vld [vmem:[#allocation9 + $0x2a0] sm:$0xff] }
  0xff   : > { %1887 = vmatpush.bf16.msra.mxu0 %v2871_v55  ;;  %v2905_v55 = vld [vmem:[#allocation9 + $0x338] sm:$0xff] }
 0x101   : > { %3143 = vrot.lane.b32.xlu0 %v3142_v9, %s3347_s13  ;;  %1822 = vmatpush.bf16.msra.mxu3 %v2826_v42  ;;  %v2877_v9 = vld [vmem:[#allocation9 + $0x258] sm:$0xff] }
 0x102   : > { %3148 = vrot.lane.b32.xlu1 %v3147_v25, %s3347_s13  ;;  %1859 = vmatpush.bf16.msrb.mxu2 %v2855_v44  ;;  %v2876_v25 = vld [vmem:[#allocation9 + $0x250] sm:$0xff] }
 0x103   : > { %1888 = vmatpush.bf16.msra.mxu0 %v2870_v59  ;;  %1901 = vmatpush.bf16.msra.mxu1 %v2879_v2 }
 0x104   : > { %3133 = vrot.lane.b32.xlu2 %v3132_v27, %s3347_s13  ;;  %v2874_v27 = vld [vmem:[#allocation9 + $0x240] sm:$0xff] }
 0x105   : > { %1871 = vmatpush.bf16.msrb.mxu3 %v2865_v46 }
 0x106   : > { %1860 = vmatpush.bf16.msrb.mxu2 %v2854_v51 }
 0x107   : > { %1889 = vmatpush.bf16.msra.mxu0 %v2869_v1  ;;  %1902 = vmatpush.bf16.msra.mxu1 %v2878_v5 }
 0x109   : > { %3153 = vrot.lane.b32.xlu0 %v3152_v32, %s3348_s30  ;;  %1872 = vmatpush.bf16.msrb.mxu3 %v2864_v52  ;;  %v2897_v52 = vld [vmem:[#allocation9 + $0x2f8] sm:$0xff] }
 0x10a   : > { %3158 = vrot.lane.b32.xlu1 %v3157_v35, %s3348_s30  ;;  %1861 = vmatpush.bf16.msrb.mxu2 %v2853_v54 }
 0x10b   : > { %1890 = vmatpush.bf16.msra.mxu0 %v2868_v61  ;;  %1903 = vmatpush.bf16.msra.mxu1 %v2877_v9 }
 0x10c   : > { %3138 = vrot.lane.b32.xlu2 %v3137_v36, %s3348_s30  ;;  %v2889_v36 = vld [vmem:[#allocation9 + $0x2b8] sm:$0xff] }
 0x10d   : > { %1873 = vmatpush.bf16.msrb.mxu3 %v2863_v45  ;;  %v2887_v45 = vld [vmem:[#allocation9 + $0x2a8] sm:$0xff] }
 0x10e   : > { %1862 = vmatpush.bf16.msrb.mxu2 %v2852_v57  ;;  %v2896_v57 = vld [vmem:[#allocation9 + $0x2f0] sm:$0xff] }
 0x10f   : > { %1891 = vmatpush.bf16.msra.mxu0 %v2867_v7  ;;  %1904 = vmatpush.bf16.msra.mxu1 %v2876_v25  ;;  %v2895_v7 = vld [vmem:[#allocation9 + $0x2e8] sm:$0xff] }
 0x111   : > { %1874 = vmatpush.bf16.msrb.mxu3 %v2862_v58 }
 0x112   : > { %1863 = vmatpush.bf16.msrb.mxu2 %v2851_v63  ;;  %v2904_v63 = vld [vmem:[#allocation9 + $0x330] sm:$0xff] }
 0x113   : > { %1892 = vmatpush.bf16.msra.mxu0 %v2866_v20  ;;  %1905 = vmatpush.bf16.msra.mxu1 %v2875_v26 }
 0x114   : > { %3163 = vrot.lane.b32.xlu2 %v3162_v49, %s3348_s30  ;;  %v2888_v49 = vld [vmem:[#allocation9 + $0x2b0] sm:$0xff] }
 0x115   : > { %1875 = vmatpush.bf16.msrb.mxu3 %v2861_v0 }
 0x116   : > { %1864 = vmatpush.bf16.msrb.mxu2 %v2850_v3 }
 0x117   : > { %1906 = vmatpush.bf16.msra.mxu1 %v2874_v27  ;;  %v2884_v27 = vld [vmem:[#allocation9 + $0x290] sm:$0xff] }
 0x119   : > { %1876 = vmatpush.bf16.msrb.mxu3 %v2860_v4 }
 0x11d   : > { %1877 = vmatpush.bf16.msrb.mxu3 %v2859_v6  ;;  %v2885_v6 = vld [vmem:[#allocation9 + $0x298] sm:$0xff] }
 0x121   : > { %1878 = vmatpush.bf16.msrb.mxu3 %v2858_v18  ;;  %v2903_v18 = vld [vmem:[#allocation9 + $0x328] sm:$0xff] }
 0x12e   : > { %v3054_v19 = vpop.permute.xlu2 %3053 }
 0x12f   : > { %v3056_v29 = vunpack.i.h.bf16 %v3054_v19  ;;  %v3055_v30 = vunpack.i.l.bf16 %v3054_v19  ;;  %v2913_v19 = vld [vmem:[#allocation9 + $0x378] sm:$0xff] }
 0x131   : > { %v383_v35 = vsel %vm381_vm11, %v3055_v30, %v3056_v29 }
 0x136   : > { %v3059_v28 = vpop.permute.xlu2 %3058 }
 0x137   : > { %v3061_v38 = vunpack.i.h.bf16 %v3059_v28  ;;  %v3060_v39 = vunpack.i.l.bf16 %v3059_v28  ;;  %v2894_v28 = vld [vmem:[#allocation9 + $0x2e0] sm:$0xff] }
 0x139   : > { %v398_v50 = vsel %vm381_vm11, %v3060_v39, %v3061_v38 }
 0x13e   : > { %v3079_v37 = vpop.permute.xlu2 %3078 }
 0x13f   : > { %v3081_v41 = vunpack.i.h.bf16 %v3079_v37  ;;  %v3080_v60 = vunpack.i.l.bf16 %v3079_v37 }
 0x141   : > { %v3644_v54 = vsel %vm410_vm12, %v3080_v60, %v3081_v41 }
 0x144   : > { %v3049_v31 = vpop.permute.xlu1 %3048 }
 0x145   : > { %v3051_v32 = vunpack.i.h.bf16 %v3049_v31  ;;  %v3050_v33 = vunpack.i.l.bf16 %v3049_v31 }
 0x146   : > { %v3089_v58 = vpop.permute.xlu2 %3088 }
 0x147   : > { %v382_v34 = vsel %vm381_vm11, %v3050_v33, %v3051_v32  ;;  %v3091_v20 = vunpack.i.h.bf16 %v3089_v58  ;;  %v3090_v25 = vunpack.i.l.bf16 %v3089_v58  ;;  %v2902_v32 = vld [vmem:[#allocation9 + $0x320] sm:$0xff]  ;;  %v2912_v33 = vld [vmem:[#allocation9 + $0x370] sm:$0xff]  ;;  %v2899_v58 = vld [vmem:[#allocation9 + $0x308] sm:$0xff] }
 0x148   : > { %v601_v47 = vpack.c.bf16 %v383_v35, %v382_v34 }
 0x149   : > { %v461_v35 = vsel %vm381_vm11, %v3090_v25, %v3091_v20  ;;  %v2937_v20 = vld [vmem:[#allocation9 + $0x438] sm:$0xff] }
 0x14a   : > { %1809 = vmatmul.bf16.vlgmr.msra.gmra.mxu2 %v601_v47  ;;  %v2911_v47 = vld [vmem:[#allocation9 + $0x368] sm:$0xff] }
 0x14b   : > { %1913 = vmatpush.bf16.msra.mxu2 %v2889_v36  ;;  %v3069_v42 = vpop.permute.xlu0 %3068 }
 0x14c   : > { %v3071_v40 = vunpack.i.h.bf16 %v3069_v42  ;;  %v3070_v43 = vunpack.i.l.bf16 %v3069_v42  ;;  %v3064_v44 = vpop.permute.xlu1 %3063 }
 0x14d   : > { %v3066_v46 = vunpack.i.h.bf16 %v3064_v44  ;;  %v3065_v48 = vunpack.i.l.bf16 %v3064_v44 }
 0x14e   : > { %v399_v51 = vsel %vm381_vm11, %v3070_v43, %v3071_v40  ;;  %v3104_v34 = vpop.permute.xlu2 %3103  ;;  %v2892_v40 = vld [vmem:[#allocation9 + $0x2d0] sm:$0xff] }
 0x14f   : > { %1914 = vmatpush.bf16.msra.mxu2 %v2888_v49  ;;  %v602_v11 = vpack.c.bf16 %v399_v51, %v398_v50  ;;  %v411_v53 = vsel %vm410_vm12, %v3065_v48, %v3066_v46  ;;  %v3106_v41 = vunpack.i.h.bf16 %v3104_v34  ;;  %v3105_v60 = vunpack.i.l.bf16 %v3104_v34  ;;  %v2882_v49 = vld [vmem:[#allocation9 + $0x280] sm:$0xff]  ;;  %v2900_v48 = vld [vmem:[#allocation9 + $0x310] sm:$0xff]  ;;  %v2917_v34 = vld [vmem:[#allocation9 + $0x398] sm:$0xff] }
 0x150   : > { %v603_v56 = vpack.c.bf16 %v3644_v54, %v411_v53  ;;  %v2910_v50 = vld [vmem:[#allocation9 + $0x360] sm:$0xff] }
 0x151   : > { %1823 = vmatmul.bf16.vlgmr.msra.gmra.mxu3 %v602_v11  ;;  %v481_v11 = vsel %vm381_vm11, %v3105_v60, %v3106_v41  ;;  %v2933_v41 = vld [vmem:[#allocation9 + $0x418] sm:$0xff]  ;;  %v2943_v60 = vld [vmem:[#allocation9 + $0x468] sm:$0xff] }
 0x152   : > { %1837 = vmatmul.bf16.vlgmr.msrb.gmra.mxu0 %v603_v56  ;;  %1927 = vmatpush.bf16.msra.mxu3 %v2897_v52 }
 0x153   : > { %1915 = vmatpush.bf16.msra.mxu2 %v2887_v45  ;;  %1941 = vmatpush.bf16.msrb.mxu0 %v2905_v55  ;;  %v3074_v59 = vpop.permute.xlu0 %3073  ;;  %v2891_v55 = vld [vmem:[#allocation9 + $0x2c8] sm:$0xff] }
 0x154   : > { %v3076_v0 = vunpack.i.h.bf16 %v3074_v59  ;;  %v3075_v1 = vunpack.i.l.bf16 %v3074_v59  ;;  %v3084_v2 = vpop.permute.xlu1 %3083  ;;  %v2909_v59 = vld [vmem:[#allocation9 + $0x358] sm:$0xff] }
 0x155   : > { %v3086_v3 = vunpack.i.h.bf16 %v3084_v2  ;;  %v3085_v4 = vunpack.i.l.bf16 %v3084_v2  ;;  %v2890_v2 = vld [vmem:[#allocation9 + $0x2c0] sm:$0xff] }
 0x156   : > { %1928 = vmatpush.bf16.msra.mxu3 %v2896_v57  ;;  %v423_v61 = vsel %vm410_vm12, %v3075_v1, %v3076_v0  ;;  %v3119_v53 = vpop.permute.xlu2 %3118 }
 0x157   : > { %1916 = vmatpush.bf16.msra.mxu2 %v2886_v62  ;;  %1942 = vmatpush.bf16.msrb.mxu0 %v2904_v63  ;;  %v3649_v5 = vsel %vm410_vm12, %v3085_v4, %v3086_v3  ;;  %v2920_v62 = vld [vmem:[#allocation9 + $0x3b0] sm:$0xff]  ;;  %v3121_v63 = vunpack.i.h.bf16 %v3119_v53  ;;  %v3120_v0 = vunpack.i.l.bf16 %v3119_v53 }
 0x158   : > { %v604_v9 = vpack.c.bf16 %v3649_v5, %v423_v61  ;;  %v2898_v61 = vld [vmem:[#allocation9 + $0x300] sm:$0xff] }
 0x15a   : > { %1851 = vmatmul.bf16.vlgmr.msrb.gmra.mxu1 %v604_v9  ;;  %1865 = vmatmul.bf16.vlgmr.msrb.gmra.mxu2 %v605_v23  ;;  %v2901_v23 = vld [vmem:[#allocation9 + $0x318] sm:$0xff] }
 0x15b   : > { %1917 = vmatpush.bf16.msra.mxu2 %v2885_v6  ;;  %1929 = vmatpush.bf16.msra.mxu3 %v2895_v7  ;;  %v3094_v26 = vpop.permute.xlu0 %3093  ;;  %v2908_v6 = vld [vmem:[#allocation9 + $0x350] sm:$0xff]  ;;  %v2919_v7 = vld [vmem:[#allocation9 + $0x3a8] sm:$0xff]  ;;  %v2929_v9 = vld [vmem:[#allocation9 + $0x3f8] sm:$0xff] }
 0x15c   : > { %1943 = vmatpush.bf16.msrb.mxu0 %v2903_v18  ;;  %1955 = vmatpush.bf16.msrb.mxu1 %v2913_v19  ;;  %v3096_v29 = vunpack.i.h.bf16 %v3094_v26  ;;  %v3095_v30 = vunpack.i.l.bf16 %v3094_v26  ;;  %v3099_v31 = vpop.permute.xlu1 %3098  ;;  %v504_v18 = vsel %vm410_vm12, %v3120_v0, %v3121_v63  ;;  %v2907_v26 = vld [vmem:[#allocation9 + $0x348] sm:$0xff] }
 0x15d   : > { %v3101_v38 = vunpack.i.h.bf16 %v3099_v31  ;;  %v3100_v39 = vunpack.i.l.bf16 %v3099_v31 }
 0x15e   : > { %v462_v36 = vsel %vm381_vm11, %v3095_v30, %v3096_v29  ;;  %v2936_v30 = vld [vmem:[#allocation9 + $0x430] sm:$0xff]  ;;  %v3134_v31 = vpop.permute.xlu2 %3133 }
 0x15f   : > { %v607_v37 = vpack.c.bf16 %v462_v36, %v461_v35  ;;  %1918 = vmatpush.bf16.msra.mxu2 %v2884_v27  ;;  %1930 = vmatpush.bf16.msra.mxu3 %v2894_v28  ;;  %v480_v51 = vsel %vm381_vm11, %v3100_v39, %v3101_v38  ;;  %v2918_v27 = vld [vmem:[#allocation9 + $0x3a0] sm:$0xff]  ;;  %v2928_v28 = vld [vmem:[#allocation9 + $0x3f0] sm:$0xff]  ;;  %v2927_v35 = vld [vmem:[#allocation9 + $0x3e8] sm:$0xff] }
 0x160   : > { %1944 = vmatpush.bf16.msrb.mxu0 %v2902_v32  ;;  %1956 = vmatpush.bf16.msrb.mxu1 %v2912_v33  ;;  %v608_v56 = vpack.c.bf16 %v481_v11, %v480_v51  ;;  %v2906_v33 = vld [vmem:[#allocation9 + $0x340] sm:$0xff]  ;;  %v2935_v36 = vld [vmem:[#allocation9 + $0x428] sm:$0xff] }
 0x161   : > { %1879 = vmatmul.bf16.vlgmr.msrb.gmra.mxu3 %v606_v24  ;;  %v2942_v51 = vld [vmem:[#allocation9 + $0x460] sm:$0xff] }
 0x162   : > { %1893 = vmatmul.bf16.vlgmr.msra.gmra.mxu0 %v607_v37  ;;  %v2945_v37 = vld [vmem:[#allocation9 + $0x478] sm:$0xff] }
 0x163   : > { %1919 = vmatpush.bf16.msra.mxu2 %v2883_v12  ;;  %1931 = vmatpush.bf16.msra.mxu3 %v2893_v13  ;;  %v3109_v42 = vpop.permute.xlu0 %3108  ;;  %v2916_v12 = vld [vmem:[#allocation9 + $0x390] sm:$0xff]  ;;  %v2926_v13 = vld [vmem:[#allocation9 + $0x3e0] sm:$0xff] }
 0x164   : > { %1945 = vmatpush.bf16.msrb.mxu0 %v2901_v23  ;;  %1957 = vmatpush.bf16.msrb.mxu1 %v2911_v47  ;;  %v3111_v43 = vunpack.i.h.bf16 %v3109_v42  ;;  %v3110_v44 = vunpack.i.l.bf16 %v3109_v42  ;;  %v3114_v46 = vpop.permute.xlu1 %3113  ;;  %v2915_v23 = vld [vmem:[#allocation9 + $0x388] sm:$0xff]  ;;  %v2925_v47 = vld [vmem:[#allocation9 + $0x3d8] sm:$0xff] }
 0x165   : > { %v3116_v52 = vunpack.i.h.bf16 %v3114_v46  ;;  %v3115_v14 = vunpack.i.l.bf16 %v3114_v46 }
 0x166   : > { %v492_v24 = vsel %vm410_vm12, %v3110_v44, %v3111_v43  ;;  %v3139_v38 = vpop.permute.xlu2 %3138  ;;  %v3135_v43 = vunpack.i.l.bf16 %v3134_v31 }
 0x167   : > { %v493_v45 = vsel %vm410_vm12, %v3115_v14, %v3116_v52  ;;  %1920 = vmatpush.bf16.msra.mxu2 %v2882_v49  ;;  %1932 = vmatpush.bf16.msra.mxu3 %v2892_v40  ;;  %v3136_v40 = vunpack.i.h.bf16 %v3134_v31 }
 0x168   : > { %v609_v57 = vpack.c.bf16 %v493_v45, %v492_v24  ;;  %1946 = vmatpush.bf16.msrb.mxu0 %v2900_v48  ;;  %1958 = vmatpush.bf16.msrb.mxu1 %v2910_v50  ;;  %v3140_v48 = vunpack.i.l.bf16 %v3139_v38  ;;  %v2932_v50 = vld [vmem:[#allocation9 + $0x410] sm:$0xff]  ;;  %v2923_v24 = vld [vmem:[#allocation9 + $0x3c8] sm:$0xff] }
 0x169   : > { %v543_v14 = vsel %vm381_vm11, %v3135_v43, %v3136_v40 }
 0x16a   : > { %1907 = vmatmul.bf16.vlgmr.msra.gmra.mxu1 %v608_v56  ;;  %1921 = vmatmul.bf16.vlgmr.msra.gmra.mxu2 %v609_v57  ;;  %v2941_v56 = vld [vmem:[#allocation9 + $0x458] sm:$0xff] }
 0x16b   : > { %1969 = vmatpush.bf16.msrb.mxu2 %v2921_v15  ;;  %1933 = vmatpush.bf16.msra.mxu3 %v2891_v55  ;;  %v3124_v1 = vpop.permute.xlu0 %3123  ;;  %v2931_v55 = vld [vmem:[#allocation9 + $0x408] sm:$0xff] }
 0x16c   : > { %1947 = vmatpush.bf16.msrb.mxu0 %v2899_v58  ;;  %1959 = vmatpush.bf16.msrb.mxu1 %v2909_v59  ;;  %v3126_v3 = vunpack.i.h.bf16 %v3124_v1  ;;  %v3125_v4 = vunpack.i.l.bf16 %v3124_v1  ;;  %v3129_v29 = vpop.permute.xlu1 %3128 }
 0x16d   : > { %v3131_v42 = vunpack.i.h.bf16 %v3129_v29  ;;  %v3130_v49 = vunpack.i.l.bf16 %v3129_v29 }
 0x16e   : > { %v505_v19 = vsel %vm410_vm12, %v3125_v4, %v3126_v3  ;;  %v3164_v63 = vpop.permute.xlu2 %3163  ;;  %v2922_v3 = vld [vmem:[#allocation9 + $0x3c0] sm:$0xff]  ;;  %v586_v4 = vrot.slane %v3644_v54, 2 }
 0x16f   : > { %1970 = vmatpush.bf16.msrb.mxu2 %v2920_v62  ;;  %v610_v25 = vpack.c.bf16 %v505_v19, %v504_v18  ;;  %1934 = vmatpush.bf16.msra.mxu3 %v2890_v2  ;;  %v542_v52 = vsel %vm381_vm11, %v3130_v49, %v3131_v42  ;;  %v3165_v18 = vunpack.i.l.bf16 %v3164_v63 }
 0x170   : > { %1948 = vmatpush.bf16.msrb.mxu0 %v2898_v61  ;;  %1960 = vmatpush.bf16.msrb.mxu1 %v2908_v6  ;;  %v613_v53 = vpack.c.bf16 %v543_v14, %v542_v52  ;;  %v2930_v6 = vld [vmem:[#allocation9 + $0x400] sm:$0xff] }
 0x172   : > { %1935 = vmatmul.bf16.vlgmr.msra.gmra.mxu3 %v610_v25 }
 0x173   : > { %1971 = vmatpush.bf16.msrb.mxu2 %v2919_v7  ;;  %1983 = vmatpush.bf16.msrb.mxu3 %v2929_v9  ;;  %v3669_v32 = vpop.permute.xlu0 %3143  ;;  %v2940_v7 = vld [vmem:[#allocation9 + $0x450] sm:$0xff]  ;;  %v3166_v9 = vunpack.i.h.bf16 %v3164_v63 }
 0x174   : > { %1997 = vmatpush.bf16.msra.mxu0 %v2937_v20  ;;  %1961 = vmatpush.bf16.msrb.mxu1 %v2907_v26  ;;  %v3146_v57 = vunpack.i.h.bf16 %v3669_v32  ;;  %v3145_v58 = vunpack.i.l.bf16 %v3669_v32  ;;  %v589_v32 = vrot.slane %v3649_v5, 2 }
 0x175   : > { %1949 = vmatmul.bf16.vlgmr.msrb.gmra.mxu0 %v611_v17  ;;  %v3149_v17 = vpop.permute.xlu1 %3148  ;;  %v584_v29 = vsel %vm410_vm12, %v3165_v18, %v3166_v9 }
 0x176   : > { %v3151_v59 = vunpack.i.h.bf16 %v3149_v17  ;;  %v3150_v62 = vunpack.i.l.bf16 %v3149_v17  ;;  %v561_v19 = vsel %vm381_vm11, %v3145_v58, %v3146_v57 }
 0x177   : > { %1972 = vmatpush.bf16.msrb.mxu2 %v2918_v27  ;;  %1984 = vmatpush.bf16.msrb.mxu3 %v2928_v28  ;;  %v2939_v28 = vld [vmem:[#allocation9 + $0x448] sm:$0xff] }
 0x178   : > { %1998 = vmatpush.bf16.msra.mxu0 %v2936_v30  ;;  %1962 = vmatpush.bf16.msrb.mxu1 %v2906_v33  ;;  %v562_v20 = vsel %vm381_vm11, %v3150_v62, %v3151_v59  ;;  %v593_v33 = vrot.slane %v584_v29, 2 }
 0x179   : > { %v614_v27 = vpack.c.bf16 %v562_v20, %v561_v19 }
 0x17b   : > { %1973 = vmatpush.bf16.msrb.mxu2 %v2917_v34  ;;  %1985 = vmatpush.bf16.msrb.mxu3 %v2927_v35  ;;  %v3154_v39 = vpop.permute.xlu0 %3153  ;;  %v2938_v34 = vld [vmem:[#allocation9 + $0x440] sm:$0xff] }
 0x17c   : > { %1999 = vmatpush.bf16.msra.mxu0 %v2935_v36  ;;  %2011 = vmatpush.bf16.msra.mxu1 %v2945_v37  ;;  %v3156_v44 = vunpack.i.h.bf16 %v3154_v39  ;;  %v3155_v46 = vunpack.i.l.bf16 %v3154_v39  ;;  %v594_v36 = vsel %vm510_vm10, %v589_v32, %v593_v33 }
 0x17d   : > { %1963 = vmatmul.bf16.vlgmr.msrb.gmra.mxu1 %v612_v22  ;;  %v3141_v22 = vunpack.i.h.bf16 %v3139_v38  ;;  %v3159_v45 = vpop.permute.xlu1 %3158 }
 0x17e   : > { %v574_v15 = vsel %vm410_vm12, %v3155_v46, %v3156_v44  ;;  %v3161_v1 = vunpack.i.h.bf16 %v3159_v45  ;;  %v3160_v2 = vunpack.i.l.bf16 %v3159_v45 }
 0x17f   : > { %1974 = vmatpush.bf16.msrb.mxu2 %v2916_v12  ;;  %1986 = vmatpush.bf16.msrb.mxu3 %v2926_v13  ;;  %v573_v11 = vsel %vm410_vm12, %v3140_v48, %v3141_v22  ;;  %v591_v0 = vrot.slane %v574_v15, 2  ;;  %v1782_v12 = vpop.f32.mrf.mxu0  ;;  %v1796_v13 = vpop.f32.mrf.mxu1 }
 0x180   : > { %2000 = vmatpush.bf16.msra.mxu0 %v2934_v8  ;;  %2012 = vmatpush.bf16.msra.mxu1 %v2944_v10  ;;  %v585_v61 = vrot.slane %v573_v11, 2  ;;  %v583_v26 = vsel %vm410_vm12, %v3160_v2, %v3161_v1 }
 0x181   : > { %v592_v25 = vsel %vm510_vm10, %v586_v4, %v591_v0  ;;  %v588_v31 = vrot.slane %v583_v26, 2 }
 0x182   : > { %v587_v54 = vsel %vm510_vm10, %v585_v61, %v586_v4 }
 0x183   : > { %1975 = vmatpush.bf16.msrb.mxu2 %v2915_v23  ;;  %1987 = vmatpush.bf16.msrb.mxu3 %v2925_v47  ;;  %v615_v30 = vpack.c.bf16 %v592_v25, %v587_v54  ;;  %v590_v35 = vsel %vm510_vm10, %v588_v31, %v589_v32 }
 0x184   : > { %2001 = vmatpush.bf16.msra.mxu0 %v2933_v41  ;;  %2013 = vmatpush.bf16.msra.mxu1 %v2943_v60  ;;  %v616_v37 = vpack.c.bf16 %v594_v36, %v590_v35  ;;  %v3167_v60 = vld [vmem:[%s3733_s3] ss:$0 sm:$0xff] }
 0x185   : > { %v1783_v40 = vadd.f32 %v3167_v60, %v1782_v12 }
 0x187   : > { %1976 = vmatpush.bf16.msrb.mxu2 %v2914_v16  ;;  %1988 = vmatpush.bf16.msrb.mxu3 %v2924_v21  ;;  %v1784_v8 = vpop.f32.mrf.mxu0  ;;  %v1798_v17 = vpop.f32.mrf.mxu1  ;;  %v1797_v43 = vadd.f32 %v1796_v13, %v1783_v40 }
 0x188   : > { %2002 = vmatpush.bf16.msra.mxu0 %v2932_v50  ;;  %2014 = vmatpush.bf16.msra.mxu1 %v2942_v51  ;;  %v1785_v50 = vadd.f32 %v3167_v60, %v1784_v8 }
 0x18a   : > { %1977 = vmatmul.bf16.vlgmr.msrb.gmra.mxu2 %v613_v53  ;;  %v1799_v51 = vadd.f32 %v1798_v17, %v1785_v50  ;;  %v2960_v50 = vld [vmem:[%s3511_s27] sm:$0xff]   ;;  %s3286_s27 = scalar_lea.hbm %s3734_s4, 32 }
 0x18b   : > { %1989 = vmatpush.bf16.msrb.mxu3 %v2923_v24 }
 0x18c   : > { %2003 = vmatpush.bf16.msra.mxu0 %v2931_v55  ;;  %2015 = vmatpush.bf16.msra.mxu1 %v2941_v56 }
 0x18f   : > { %1990 = vmatpush.bf16.msrb.mxu3 %v2922_v3 }
 0x190   : > { %2004 = vmatpush.bf16.msra.mxu0 %v2930_v6  ;;  %2016 = vmatpush.bf16.msra.mxu1 %v2940_v7 }
 0x192   : > { %1991 = vmatmul.bf16.vlgmr.msrb.gmra.mxu3 %v614_v27 }
 0x193   : > { %2005 = vmatmul.bf16.vlgmr.msra.gmra.mxu0 %v615_v30 }
 0x194   : > { %2017 = vmatpush.bf16.msra.mxu1 %v2939_v28 }
 0x198   : > { %2018 = vmatpush.bf16.msra.mxu1 %v2938_v34 }
 0x19b   : > { %2019 = vmatmul.bf16.vlgmr.msra.gmra.mxu1 %v616_v37 }
 0x1cd   : > { %v1810_v10 = vpop.f32.mrf.mxu2 }
 0x1ce   : > { %v1811_v16 = vadd.f32 %v1810_v10, %v1797_v43 }
 0x1cf   : > { %v1838_v23 = vpop.f32.mrf.mxu0 }
 0x1d4   : > { %v1824_v47 = vpop.f32.mrf.mxu3 }
 0x1d5   : > { %v1812_v39 = vpop.f32.mrf.mxu2  ;;  %v1825_v21 = vadd.f32 %v1824_v47, %v1811_v16 }
 0x1d6   : > { %v1813_v14 = vadd.f32 %v1812_v39, %v1799_v51 }
 0x1d7   : > { %v1852_v38 = vpop.f32.mrf.mxu1  ;;  %v1840_v5 = vpop.f32.mrf.mxu0  ;;  %v1839_v52 = vadd.f32 %v1838_v23, %v1825_v21 }
 0x1d9   : > { %v1853_v11 = vadd.f32 %v1852_v38, %v1839_v52 }
 0x1dc   : > { %v1826_v41 = vpop.f32.mrf.mxu3 }
 0x1dd   : > { %v1866_v49 = vpop.f32.mrf.mxu2  ;;  %v1827_v53 = vadd.f32 %v1826_v41, %v1813_v14 }
 0x1de   : > { %v1867_v45 = vadd.f32 %v1866_v49, %v1853_v11  ;;  %v2961_v11 = vunpack.c.l.bf16 %v2960_v50 }
 0x1df   : > { %v1854_v42 = vpop.f32.mrf.mxu1  ;;  %v1894_v44 = vpop.f32.mrf.mxu0  ;;  %v1841_v57 = vadd.f32 %v1840_v5, %v1827_v53 }
 0x1e1   : > { %v1855_v59 = vadd.f32 %v1854_v42, %v1841_v57 }
 0x1e4   : > { %v1880_v46 = vpop.f32.mrf.mxu3 }
 0x1e5   : > { %v1868_v48 = vpop.f32.mrf.mxu2  ;;  %v1881_v58 = vadd.f32 %v1880_v46, %v1867_v45 }
 0x1e6   : > { %v1869_v1 = vadd.f32 %v1868_v48, %v1855_v59  ;;  %v2956_v48 = vld [vmem:[%s3504_s14] sm:$0xff]   ;;  %s3282_s14 = scalar_lea.hbm %s3281_s25, 16 }
 0x1e7   : > { %v1908_v22 = vpop.f32.mrf.mxu1  ;;  %v1896_v15 = vpop.f32.mrf.mxu0  ;;  %v1895_v62 = vadd.f32 %v1894_v44, %v1881_v58  ;;  %p3283_p1 = scmp.ne.s32.totalorder %s3281_s25, %s3282_s14  ;;  %p3288_p10 = scmp.lt.s32.totalorder %s3286_s27, %s3282_s14 }
 0x1e9   : > { %v1909_v2 = vadd.f32 %v1908_v22, %v1895_v62  ;;  %p3284_p4 = pnand %p3283_p1, %p3445_p7  ;;  %p3289_p2 = por %p3288_p10, %p3287_p9 }
 0x1eb   : > { %p3285_p8 = pneg %p3284_p4 }
 0x1ec   : > { %v1882_v24 = vpop.f32.mrf.mxu3 }
 0x1ed   : > { %v1922_v56 = vpop.f32.mrf.mxu2  ;;  %v1883_v3 = vadd.f32 %v1882_v24, %v1869_v1  ;;  %p3290_p11 = pnand %p3289_p2, %p3285_p8 }
 0x1ee   : > { %v1923_v6 = vadd.f32 %v1922_v56, %v1909_v2 }
 0x1ef   : > { %v1910_v55 = vpop.f32.mrf.mxu1  ;;  %v1897_v7 = vadd.f32 %v1896_v15, %v1883_v3  ;;  %v2957_v15 = vunpack.c.l.bf16 %v2956_v48 }
 0x1f1   : > { %v1911_v20 = vadd.f32 %v1910_v55, %v1897_v7 }
 0x1f2   : > { %v1950_v63 = vpop.f32.mrf.mxu0 }
 0x1f5   : > { %v1936_v0 = vpop.f32.mrf.mxu3  ;;  %v1924_v61 = vpop.f32.mrf.mxu2 }
 0x1f6   : > { %v1937_v9 = vadd.f32 %v1936_v0, %v1923_v6  ;;  %v1925_v27 = vadd.f32 %v1924_v61, %v1911_v20  ;;  %v2962_v61 = vunpack.c.h.bf16 %v2960_v50 }
 0x1f8   : > { %v1951_v25 = vadd.f32 %v1950_v63, %v1937_v9 }
 0x1fa   : > { %v1964_v4 = vpop.f32.mrf.mxu1  ;;  %v1952_v18 = vpop.f32.mrf.mxu0 }
 0x1fb   : > { %v1965_v28 = vadd.f32 %v1964_v4, %v1951_v25  ;;  %v2958_v4 = vunpack.c.h.bf16 %v2956_v48 }
 0x1fd   : > { %v1938_v19 = vpop.f32.mrf.mxu3 }
 0x1fe   : > { %v1939_v29 = vadd.f32 %v1938_v19, %v1925_v27 }
 0x200   : > { %v1953_v33 = vadd.f32 %v1952_v18, %v1939_v29 }
 0x202   : > { %v1966_v54 = vpop.f32.mrf.mxu1 }
 0x203   : > { %v1967_v12 = vadd.f32 %v1966_v54, %v1953_v33 }
 0x20d   : > { %v1978_v26 = vpop.f32.mrf.mxu2 }
 0x20e   : > { %v1979_v30 = vadd.f32 %v1978_v26, %v1965_v28 }
 0x210   : > { %v2006_v31 = vpop.f32.mrf.mxu0 }
 0x215   : > { %v1992_v32 = vpop.f32.mrf.mxu3  ;;  %v1980_v37 = vpop.f32.mrf.mxu2 }
 0x216   : > { %v1993_v34 = vadd.f32 %v1992_v32, %v1979_v30  ;;  %v1981_v8 = vadd.f32 %v1980_v37, %v1967_v12 }
 0x218   : > { %v2007_v35 = vadd.f32 %v2006_v31, %v1993_v34  ;;  %v2020_v36 = vpop.f32.mrf.mxu1  ;;  %v2008_v47 = vpop.f32.mrf.mxu0 }
 0x21a   : > { %v2021_v13 = vadd.f32 %v2020_v36, %v2007_v35 }
 0x21c   : > { %v2793_v10 = vmul.f32 -1.442695, %v2021_v13 }
 0x21d   : > { %v1994_v17 = vpop.f32.mrf.mxu3 }
 0x21e   : > { %3168 = vpow2.f32 %v2793_v10  ;;  %v1995_v23 = vadd.f32 %v1994_v17, %v1981_v8 }
 0x220   : > { %v2009_v38 = vadd.f32 %v2008_v47, %v1995_v23  ;;  %v2022_v39 = vpop.f32.mrf.mxu1 }
 0x222   : > { %v2023_v5 = vadd.f32 %v2022_v39, %v2009_v38 }
 0x224   : > { %v3169_v41 = vpop.eup %3168  ;;  %v2794_v60 = vmul.f32 -1.442695, %v2023_v5 }
 0x225   : > { %v2031_v42 = vadd.f32 1.0, %v3169_v41 }
 0x226   : > { %3170 = vpow2.f32 %v2794_v60 }
 0x227   : > { %3172 = vrcp.f32 %v2031_v42  ;;  %v2044_v16 = vand.u32 2147483648, %v2031_v42  ;;  %v2042_v22 = vand.u32 2147483647, %v2031_v42  ;;  %vm2038_vm14 = vweird.f32 %v2031_v42 }
 0x229   : > { %v2045_v14 = vor.u32 1.1754944e-38, %v2044_v16  ;;  %vm2043_vm0 = vcmp.eq.f32.partialorder %v2042_v22, 8.507059e+37 }
 0x22c   : > { %v3171_v49 = vpop.eup %3170 }
 0x22d   : > { %v3173_v40 = vpop.eup %3172  ;;  %v2032_v43 = vadd.f32 1.0, %v3171_v49 }
 0x22e   : > { %v2034_v44 = vmul.f32 %v3173_v40, %v2031_v42  ;;  %vm2039_vm13 = vweird.f32 %v3173_v40 }
 0x22f   : > { %3174 = vrcp.f32 %v2032_v43  ;;  %vm2040_vm15 = vmor %vm2038_vm14, %vm2039_vm13  ;;  %v2057_v57 = vand.u32 2147483647, %v2032_v43  ;;  %v2059_v58 = vand.u32 2147483648, %v2032_v43  ;;  %vm2053_vm2 = vweird.f32 %v2032_v43 }
 0x230   : > { %v2035_v46 = vsub.f32 1.0, %v2034_v44 }
 0x231   : > { %v2060_v2 = vor.u32 1.1754944e-38, %v2059_v58  ;;  %vm2058_vm4 = vcmp.eq.f32.partialorder %v2057_v57, 8.507059e+37 }
 0x232   : > { %v2036_v21 = vmul.f32 %v3173_v40, %v2035_v46 }
 0x234   : > { %v2037_v51 = vadd.f32 %v3173_v40, %v2036_v21 }
 0x235   : > { %v3175_v52 = vpop.eup %3174 }
 0x236   : > { %v2041_v24 = vsel %vm2040_vm15, %v3173_v40, %v2037_v51  ;;  %v2049_v53 = vmul.f32 %v3175_v52, %v2032_v43  ;;  %vm2054_vm1 = vweird.f32 %v3175_v52 }
 0x237   : > { %v2046_v45 = vsel %vm2043_vm0, %v2045_v14, %v2041_v24  ;;  %vm2055_vm3 = vmor %vm2053_vm2, %vm2054_vm1 }
 0x238   : > { %v2073_v55 = vsub.f32 1.0, %v2046_v45  ;;  %v2050_v56 = vsub.f32 1.0, %v2049_v53  ;;  %v2071_v59 = vmul.f32 %v2957_v15, %v2046_v45 }
 0x23a   : > { %v2075_v62 = vmul.f32 %v2961_v11, %v2073_v55  ;;  %v2051_v63 = vmul.f32 %v3175_v52, %v2050_v56 }
 0x23c   : > { %v2052_v0 = vadd.f32 %v3175_v52, %v2051_v63  ;;  %v2077_v1 = vadd.f32 %v2075_v62, %v2071_v59 }
 0x23e   : > { %v2056_v3 = vsel %vm2055_vm3, %v3175_v52, %v2052_v0  ;;  %2079 = vst [vmem:[%s275_s20] sm:$0xff] %v2077_v1 }
 0x23f   : > { %v2061_v6 = vsel %vm2058_vm4, %v2060_v2, %v2056_v3 }
 0x240   : > { %v2074_v7 = vsub.f32 1.0, %v2061_v6  ;;  %v2072_v9 = vmul.f32 %v2958_v4, %v2061_v6 }
 0x242   : > { %v2076_v18 = vmul.f32 %v2962_v61, %v2074_v7 }
 0x244   : > { %v2078_v19 = vadd.f32 %v2076_v18, %v2072_v9 }
 0x246   : > { %2080 = vst [vmem:[%s275_s20 + $0x8] sm:$0xff] %v2078_v19 }
 0x247   : > { %3293 = shalt.err (!%p3290_p11)
}
 0x248   : > { %s3349_s23 = smov 128  }
 0x249   : > { %2971 = dma.vmem_to_hbm [thread:$0]  (%p3445_p7), %s2095_s19, 256, %s2097_s12, %s2082_s0, %s3349_s23, %s3349_s23, %s3346_s21  }
 0x24a PF: > { %s2111_s10 = sand.u32 1, %s3328_s15   ;;  %p3750_p12 = scmp.ge.s32.totalorder %s3340_s18, 2 }
 0x24b   : > { %s2112_s2 = scalar_lea.sflag [#allocation6], %s2111_s10 }
 0x24c   : > { %p2985_p13 = pnand %p3750_p12, %p3410_p6 }
 0x24e   : > { %p2986_p0 = pneg %p2985_p13 }
 0x250   : > { %3323 = dma.done.wait (%p2986_p0), %s2112_s2, 256  }
 0x251   : > { %3325 = vsyncadd (%p2986_p0), %s2112_s2, 4294967040  ;;  %p20_p3 = scmp.ge.s32.totalorder %s3428_s29, 4   ;;  %s3751_s15 = smov %s3332_s16 }
 0x252   : > { %s3752_s16 = smov %s3336_s17  ;;  %s3753_s17 = smov %s3441_s8 }
 0x253   : > { %s3754_s18 = smov %s3428_s29  ;;  %22 = sbr.rel (!%p20_p3) target bundleno = 10 (0xa), region = 98 }
 0x258   :  { %2118 = vsyncpa [#allocation5], 1 }
 0x259   :  { %2120 = vsyncpa [#allocation5 + $0x1], 1 }
 0x25a   :  { %2121 = vsyncpa [#allocation8], 1 }
 0x25b   :  { %2123 = vsyncpa [#allocation8 + $0x1], 1 }
 0x25c   :  { %2124 = vsyncpa [#allocation6], 1 }
 0x25d   :  { %2126 = vsyncpa [#allocation6 + $0x1], 1 }

</bundles_post_ra>
